<compile_context>
chip_gen: v7x
topology: tpu7x:2x2x1
jax: 0.10.0
libtpu: 0.0.40
codegen_flags: <defaults>
</compile_context>

<pallas_src>
import functools

import jax
import jax.numpy as jnp
from jax import lax
from jax.experimental import pallas as pl

_NEG = -1.0e30


# ----------------------------------------------------------------------------
# Fused decoder kernel: GRU (packed-seq semantics) + attention + log-softmax head
# ----------------------------------------------------------------------------
def decoder_kernel(y_ref, len_ref, h0_ref, ctx_ref,
                   wi_ref, wh_ref, bif_ref, bhn_ref,
                   watt_ref, batt_ref,
                   woc_ref, woo_ref, bo_ref,
                   wv_ref, bv_ref,
                   logp_ref, att_ref, hid_ref,
                   *, t_enc):
    f32, bf16 = jnp.float32, jnp.bfloat16
    Td, B, _ = y_ref.shape
    H = h0_ref.shape[-1]
    C = ctx_ref.shape[2]

    # ---------------- GRU ----------------
    # Hoisted, time-major input projection (r/z hidden biases already folded into bif).
    gi = jnp.einsum("tbe,eh->tbh", y_ref[...], wi_ref[...],
                    preferred_element_type=f32) + bif_ref[...]          # (Td, B, 3H)
    # Hoisted per-step validity masks (packed-sequence semantics).
    steps = lax.broadcasted_iota(jnp.int32, (Td, B, 1), 0).astype(f32)
    masks = (steps < len_ref[...][None, :, :]).astype(f32)              # (Td, B, 1)

    wh = wh_ref[...]                                                    # bf16 (H, 3H) fused r|z|n
    bhn = bhn_ref[...]                                                  # f32 (1, H)
    h = h0_ref[...]                                                     # f32 (B, H)

    outs = []
    for t in range(Td):   # short static trip count -> full unroll, h stays in vregs
        gi_t = gi[t]                                                    # free leading-axis slice
        gh = jnp.dot(h.astype(bf16), wh, preferred_element_type=f32)    # one recurrent MXU push
        r = jax.nn.sigmoid(gi_t[:, :H] + gh[:, :H])
        z = jax.nn.sigmoid(gi_t[:, H:2 * H] + gh[:, H:2 * H])
        n = jnp.tanh(gi_t[:, 2 * H:] + r * (gh[:, 2 * H:] + bhn))
        h_new = (1.0 - z) * n + z * h
        m = masks[t]                                                    # (B, 1)
        outs.append(m * h_new)                                          # padded steps -> zeros
        h = m * h_new + (1.0 - m) * h                                   # freeze hidden after seq end

    hid_ref[...] = h                                                    # final hidden (B, H)
    # TODO(synk): at production H/B switch to lax.fori_loop(unroll=True) + a (Td,B,H) VMEM
    # scratch (per-step o[t] store) to bound vreg live ranges; list+stack is fine at toy size.
    o = jnp.stack(outs, axis=1)                                         # (B, Td, H)

    # ---------------- Attention ----------------
    ctx = ctx_ref[...]                                                  # bf16 (B, Tep, C), zero-padded rows
    ci = jnp.einsum("bec,ch->beh", ctx, watt_ref[...],
                    preferred_element_type=f32) + batt_ref[...]         # (B, Tep, H)
    scores = jnp.einsum("btd,bed->bte", o.astype(bf16), ci.astype(bf16),
                        preferred_element_type=f32)                     # (B, Td, Tep)
    # Mask only the artificial lane padding (>= real t_enc). The original masked_fill is a
    # no-op (not in-place), so real encoder positions stay unmasked, as in the reference.
    lane = lax.broadcasted_iota(jnp.int32, scores.shape, 2)
    scores = jnp.where(lane < t_enc, scores, _NEG)
    mx = jnp.max(scores, axis=-1, keepdims=True)
    p = jnp.exp(scores - mx)
    att = p / jnp.sum(p, axis=-1, keepdims=True)                        # exact softmax
    att_ref[...] = att                                                  # lane-dense (Tep=128) store

    cvec = jnp.einsum("bte,bec->btc", att.astype(bf16), ctx,
                      preferred_element_type=f32)                       # (B, Td, C)

    # ------------- out-projection + vocab head (batch collapsed into M) -------------
    o2 = o.reshape(B * Td, H)      # Td == 8: trailing (Td,H) block is tile-aligned -> pure collapse
    cv2 = cvec.reshape(B * Td, C)
    # concat([cvec, o]) @ W_out == cvec @ W_out_c + o @ W_out_o  (no in-kernel concat)
    a = jnp.tanh(jnp.dot(cv2.astype(bf16), woc_ref[...], preferred_element_type=f32)
                 + jnp.dot(o2.astype(bf16), woo_ref[...], preferred_element_type=f32)
                 + bo_ref[...])                                         # (B*Td, H)
    logits = jnp.dot(a.astype(bf16), wv_ref[...],
                     preferred_element_type=f32) + bv_ref[...]          # (B*Td, Vp) lane-dense
    lmx = jnp.max(logits, axis=-1, keepdims=True)
    lse = jnp.log(jnp.sum(jnp.exp(logits - lmx), axis=-1, keepdims=True)) + lmx
    logp_ref[...] = logits - lse


# ----------------------------------------------------------------------------
# Decoder forward (embedding gather + param prep are JAX glue; rest in one kernel)
# ----------------------------------------------------------------------------
def _round_up(n, m):
    return ((n + m - 1) // m) * m


def decoder_forward(params, ctx, ctx_lengths, y, y_lengths, hid):
    """ctx: [B, T_enc, 2*enc_hidden] f32, y: [B, T_dec] int32, hid: [1, B, H] f32."""
    del ctx_lengths  # create_mask()'s masked_fill is not in-place in the original -> no effect
    B, Td = y.shape
    Te = ctx.shape[1]
    H = hid.shape[-1]
    V = params["w_v"].shape[-1]
    Vp, Tep = _round_up(V, 128), _round_up(Te, 128)
    f32, bf16 = jnp.float32, jnp.bfloat16

    # Kernel-ready derived params: bias folding, lane padding, bf16 MXU weights.
    b_if = params["b_i"] + jnp.concatenate(
        [params["b_h"][:, :2 * H], jnp.zeros((1, H), f32)], axis=1)
    b_hn = params["b_h"][:, 2 * H:]
    w_v_pad = jnp.pad(params["w_v"], ((0, 0), (0, Vp - V))).astype(bf16)
    b_v_pad = jnp.concatenate([params["b_v"], jnp.full((1, Vp - V), _NEG, f32)], axis=1)

    # Embedding (gather) + dropout (identity in eval).
    # TODO(synk): training-mode RNG dropout not implemented (eval-mode identity).
    y_embed = jnp.take(params["embed"], y, axis=0)                      # (B, Td, E)
    y_tm = jnp.transpose(y_embed, (1, 0, 2)).astype(bf16)               # time-major (Td, B, E)
    y_len_f = y_lengths.astype(f32)[:, None]                            # (B, 1)
    ctx_pad = jnp.pad(ctx, ((0, 0), (0, Tep - Te), (0, 0))).astype(bf16)

    logp_slab, atten_p, hid_final = pl.pallas_call(
        functools.partial(decoder_kernel, t_enc=Te),
        out_shape=(jax.ShapeDtypeStruct((B * Td, Vp), f32),   # log-prob slab (lane-dense)
                   jax.ShapeDtypeStruct((B, Td, Tep), f32),   # attention (lane-dense)
                   jax.ShapeDtypeStruct((B, H), f32)),        # final hidden
    )(y_tm, y_len_f, hid[0], ctx_pad,
      params["w_i"].astype(bf16), params["w_h"].astype(bf16), b_if, b_hn,
      params["w_att_in"].astype(bf16), params["b_att_in"],
      params["w_out_c"].astype(bf16), params["w_out_o"].astype(bf16), params["b_out"],
      w_v_pad, b_v_pad)

    logp = logp_slab.reshape(B, Td, Vp)[:, :, :V]
    atten = atten_p[:, :, :Te]
    return logp, atten, hid_final[None, :, :]                           # hid: [1, B, H]


# ----------------------------------------------------------------------------
# Pure-JAX f32 reference (PyTorch semantics, no Pallas) for a correctness spot-check
# ----------------------------------------------------------------------------
def decoder_forward_ref(params, ctx, ctx_lengths, y, y_lengths, hid):
    del ctx_lengths
    y_embed = jnp.take(params["embed"], y, axis=0)
    B, Td, _ = y_embed.shape
    H = hid.shape[-1]
    h = hid[0]
    gi = jnp.einsum("bte,eh->bth", y_embed, params["w_i"]) + params["b_i"]
    outs = []
    for t in range(Td):
        gh = h @ params["w_h"] + params["b_h"]
        g = gi[:, t, :]
        r = jax.nn.sigmoid(g[:, :H] + gh[:, :H])
        z = jax.nn.sigmoid(g[:, H:2 * H] + gh[:, H:2 * H])
        n = jnp.tanh(g[:, 2 * H:] + r * gh[:, 2 * H:])
        h_new = (1.0 - z) * n + z * h
        m = (t < y_lengths)[:, None].astype(jnp.float32)
        outs.append(m * h_new)
        h = m * h_new + (1.0 - m) * h
    o = jnp.stack(outs, axis=1)
    ci = jnp.einsum("bec,ch->beh", ctx, params["w_att_in"]) + params["b_att_in"]
    att = jax.nn.softmax(jnp.einsum("btd,bed->bte", o, ci), axis=-1)
    cvec = jnp.einsum("bte,bec->btc", att, ctx)
    a = jnp.tanh(jnp.einsum("btc,ch->bth", cvec, params["w_out_c"])
                 + jnp.einsum("bth,hk->btk", o, params["w_out_o"]) + params["b_out"])
    logits = jnp.einsum("bth,hv->btv", a, params["w_v"]) + params["b_v"]
    return jax.nn.log_softmax(logits, axis=-1), att, h[None, :, :]


def init_params(key, vocab_size, embedded_size, enc_hidden_size, dec_hidden_size):
    E, H, C, V = embedded_size, dec_hidden_size, 2 * enc_hidden_size, vocab_size
    keys = jax.random.split(key, 20)
    g = lambda k, shape, s=0.1: (s * jax.random.normal(k, shape)).astype(jnp.float32)
    # GRU gate order r, z, n (PyTorch convention); input/hidden weights fused along the 3H axis.
    w_i = jnp.concatenate([g(keys[1], (E, H)), g(keys[2], (E, H)), g(keys[3], (E, H))], axis=1)
    w_h = jnp.concatenate([g(keys[4], (H, H)), g(keys[5], (H, H)), g(keys[6], (H, H))], axis=1)
    b_i = jnp.concatenate([g(keys[7], (1, H)), g(keys[8], (1, H)), g(keys[9], (1, H))], axis=1)
    b_h = jnp.concatenate([g(keys[10], (1, H)), g(keys[11], (1, H)), g(keys[12], (1, H))], axis=1)
    return {
        "embed": g(keys[0], (V, E)),
        "w_i": w_i, "w_h": w_h, "b_i": b_i, "b_h": b_h,                     # GRU
        "w_att_in": g(keys[13], (C, H)), "b_att_in": g(keys[14], (1, H)),   # Attention.liner_in
        "w_out_c": g(keys[15], (C, H)), "w_out_o": g(keys[16], (H, H)),     # Attention.liner_out (split)
        "b_out": g(keys[17], (1, H)),
        "w_v": g(keys[18], (H, V)), "b_v": g(keys[19], (1, V)),             # Decoder.out
    }


if __name__ == "__main__":
    vocab_size, embedded_size = 50, 16
    enc_hidden_size, dec_hidden_size = 16, 32
    B, T_enc, T_dec = 2, 10, 8

    key = jax.random.PRNGKey(0)
    k_par, k_ctx, k_y, k_hid = jax.random.split(key, 4)
    params = init_params(k_par, vocab_size, embedded_size, enc_hidden_size, dec_hidden_size)

    ctx = (0.1 * jax.random.normal(k_ctx, (B, T_enc, 2 * enc_hidden_size))).astype(jnp.float32)
    ctx_lengths = jnp.array([10, 7], dtype=jnp.int32)
    y = jax.random.randint(k_y, (B, T_dec), 0, vocab_size, dtype=jnp.int32)
    y_lengths = jnp.array([8, 5], dtype=jnp.int32)   # max == T_dec (total_length semantics)
    hid = (0.1 * jax.random.normal(k_hid, (1, B, dec_hidden_size))).astype(jnp.float32)

    logp, atten, hid_out = jax.jit(decoder_forward)(params, ctx, ctx_lengths, y, y_lengths, hid)
    jax.block_until_ready((logp, atten, hid_out))

    assert logp.shape == (B, T_dec, vocab_size)
    assert atten.shape == (B, T_dec, T_enc)
    assert hid_out.shape == (1, B, dec_hidden_size)

    # Correctness spot-check against the f32 reference (tolerance covers bf16 MXU operands).
    logp_r, att_r, hid_r = decoder_forward_ref(params, ctx, ctx_lengths, y, y_lengths, hid)
    assert float(jnp.max(jnp.abs(logp - logp_r))) < 3e-2
    assert float(jnp.max(jnp.abs(atten - att_r))) < 3e-2
    assert float(jnp.max(jnp.abs(hid_out - hid_r))) < 3e-2
    assert bool(jnp.all(jnp.isfinite(logp)))

    print("KERNEL_OK")
</pallas_src>

<mosaic_0001>
module attributes {stable_mosaic.version = 11 : i64} {
  func.func @decoder_kernel(%arg0: memref<8x2x16xbf16, #tpu.memory_space<vmem>>, %arg1: memref<2x1xf32, #tpu.memory_space<vmem>>, %arg2: memref<2x32xf32, #tpu.memory_space<vmem>>, %arg3: memref<2x128x32xbf16, #tpu.memory_space<vmem>>, %arg4: memref<16x96xbf16, #tpu.memory_space<vmem>>, %arg5: memref<32x96xbf16, #tpu.memory_space<vmem>>, %arg6: memref<1x96xf32, #tpu.memory_space<vmem>>, %arg7: memref<1x32xf32, #tpu.memory_space<vmem>>, %arg8: memref<32x32xbf16, #tpu.memory_space<vmem>>, %arg9: memref<1x32xf32, #tpu.memory_space<vmem>>, %arg10: memref<32x32xbf16, #tpu.memory_space<vmem>>, %arg11: memref<32x32xbf16, #tpu.memory_space<vmem>>, %arg12: memref<1x32xf32, #tpu.memory_space<vmem>>, %arg13: memref<32x128xbf16, #tpu.memory_space<vmem>>, %arg14: memref<1x128xf32, #tpu.memory_space<vmem>>, %arg15: memref<16x128xf32, #tpu.memory_space<vmem>>, %arg16: memref<2x8x128xf32, #tpu.memory_space<vmem>>, %arg17: memref<2x32xf32, #tpu.memory_space<vmem>>) attributes {dimension_semantics = [], scalar_prefetch = 0 : i64, scratch_operands = 0 : i64, tpu.core_type = #tpu.core_type<tc>} {
    %c0 = arith.constant 0 : index
    %c0_0 = arith.constant 0 : index
    %c0_1 = arith.constant 0 : index
    %0 = vector.load %arg0[%c0, %c0_0, %c0_1] : memref<8x2x16xbf16, #tpu.memory_space<vmem>>, vector<8x2x16xbf16>
    %c0_2 = arith.constant 0 : index
    %c0_3 = arith.constant 0 : index
    %1 = vector.load %arg4[%c0_2, %c0_3] : memref<16x96xbf16, #tpu.memory_space<vmem>>, vector<16x96xbf16>
    "tpu.trace_start"() <{level = 10 : i32, message = "tbe,eh->tbh"}> : () -> ()
    %cst = arith.constant dense<0.000000e+00> : vector<8x2x96xf32>
    %2 = tpu.matmul %0, %1, %cst {dimension_numbers = #tpu.dot_dimension_numbers<[2], [0], [0, 1], [1], [0, 0, 0, 1, 1, 1], [], []>} : vector<8x2x16xbf16>, vector<16x96xbf16>, vector<8x2x96xf32> -> vector<8x2x96xf32>
    "tpu.trace_stop"() : () -> ()
    %c0_4 = arith.constant 0 : index
    %c0_5 = arith.constant 0 : index
    %3 = vector.load %arg6[%c0_4, %c0_5] : memref<1x96xf32, #tpu.memory_space<vmem>>, vector<1x96xf32>
    %4 = vector.shape_cast %3 : vector<1x96xf32> to vector<1x1x96xf32>
    %5 = vector.broadcast %4 : vector<1x1x96xf32> to vector<8x2x96xf32>
    %6 = arith.addf %2, %5 : vector<8x2x96xf32>
    %7 = tpu.iota {dimensions = array<i32: 0>} : vector<8x2x1xi32>
    %8 = arith.sitofp %7 : vector<8x2x1xi32> to vector<8x2x1xf32>
    %c0_6 = arith.constant 0 : index
    %c0_7 = arith.constant 0 : index
    %9 = vector.load %arg1[%c0_6, %c0_7] : memref<2x1xf32, #tpu.memory_space<vmem>>, vector<2x1xf32>
    %10 = vector.shape_cast %9 : vector<2x1xf32> to vector<1x2x1xf32>
    %11 = vector.broadcast %10 : vector<1x2x1xf32> to vector<8x2x1xf32>
    %12 = arith.cmpf olt, %8, %11 : vector<8x2x1xf32>
    %13 = arith.extui %12 : vector<8x2x1xi1> to vector<8x2x1xi32>
    %14 = arith.sitofp %13 : vector<8x2x1xi32> to vector<8x2x1xf32>
    %c0_8 = arith.constant 0 : index
    %c0_9 = arith.constant 0 : index
    %15 = vector.load %arg5[%c0_8, %c0_9] : memref<32x96xbf16, #tpu.memory_space<vmem>>, vector<32x96xbf16>
    %c0_10 = arith.constant 0 : index
    %c0_11 = arith.constant 0 : index
    %16 = vector.load %arg7[%c0_10, %c0_11] : memref<1x32xf32, #tpu.memory_space<vmem>>, vector<1x32xf32>
    %c0_12 = arith.constant 0 : index
    %c0_13 = arith.constant 0 : index
    %17 = vector.load %arg2[%c0_12, %c0_13] : memref<2x32xf32, #tpu.memory_space<vmem>>, vector<2x32xf32>
    %18 = vector.extract_strided_slice %6 {offsets = [0, 0, 0], sizes = [1, 2, 96], strides = [1, 1, 1]} : vector<8x2x96xf32> to vector<1x2x96xf32>
    %19 = vector.shape_cast %18 : vector<1x2x96xf32> to vector<2x96xf32>
    %20 = arith.truncf %17 : vector<2x32xf32> to vector<2x32xbf16>
    %cst_14 = arith.constant dense<0.000000e+00> : vector<2x96xf32>
    %21 = tpu.matmul %20, %15, %cst_14 {dimension_numbers = #tpu.dot_dimension_numbers<[1], [0], [0], [1], [0, 0, 1, 1], [], []>} : vector<2x32xbf16>, vector<32x96xbf16>, vector<2x96xf32> -> vector<2x96xf32>
    %22 = vector.extract_strided_slice %19 {offsets = [0, 0], sizes = [2, 32], strides = [1, 1]} : vector<2x96xf32> to vector<2x32xf32>
    %23 = vector.extract_strided_slice %21 {offsets = [0, 0], sizes = [2, 32], strides = [1, 1]} : vector<2x96xf32> to vector<2x32xf32>
    %24 = arith.addf %22, %23 : vector<2x32xf32>
    %25 = arith.negf %24 : vector<2x32xf32>
    %26 = math.exp %25 : vector<2x32xf32>
    %cst_15 = arith.constant 1.000000e+00 : f32
    %27 = vector.broadcast %cst_15 : f32 to vector<2x32xf32>
    %28 = arith.addf %27, %26 : vector<2x32xf32>
    %29 = arith.divf %27, %28 : vector<2x32xf32>
    %30 = vector.extract_strided_slice %19 {offsets = [0, 32], sizes = [2, 32], strides = [1, 1]} : vector<2x96xf32> to vector<2x32xf32>
    %31 = vector.extract_strided_slice %21 {offsets = [0, 32], sizes = [2, 32], strides = [1, 1]} : vector<2x96xf32> to vector<2x32xf32>
    %32 = arith.addf %30, %31 : vector<2x32xf32>
    %33 = arith.negf %32 : vector<2x32xf32>
    %34 = math.exp %33 : vector<2x32xf32>
    %cst_16 = arith.constant 1.000000e+00 : f32
    %35 = vector.broadcast %cst_16 : f32 to vector<2x32xf32>
    %36 = arith.addf %35, %34 : vector<2x32xf32>
    %37 = arith.divf %35, %36 : vector<2x32xf32>
    %38 = vector.extract_strided_slice %19 {offsets = [0, 64], sizes = [2, 32], strides = [1, 1]} : vector<2x96xf32> to vector<2x32xf32>
    %39 = vector.extract_strided_slice %21 {offsets = [0, 64], sizes = [2, 32], strides = [1, 1]} : vector<2x96xf32> to vector<2x32xf32>
    %40 = vector.broadcast %16 : vector<1x32xf32> to vector<2x32xf32>
    %41 = arith.addf %39, %40 : vector<2x32xf32>
    %42 = arith.mulf %29, %41 : vector<2x32xf32>
    %43 = arith.addf %38, %42 : vector<2x32xf32>
    %44 = math.tanh %43 : vector<2x32xf32>
    %cst_17 = arith.constant 1.000000e+00 : f32
    %45 = vector.broadcast %cst_17 : f32 to vector<2x32xf32>
    %46 = arith.subf %45, %37 : vector<2x32xf32>
    %47 = arith.mulf %46, %44 : vector<2x32xf32>
    %48 = arith.mulf %37, %17 : vector<2x32xf32>
    %49 = arith.addf %47, %48 : vector<2x32xf32>
    %50 = vector.extract_strided_slice %14 {offsets = [0, 0, 0], sizes = [1, 2, 1], strides = [1, 1, 1]} : vector<8x2x1xf32> to vector<1x2x1xf32>
    %51 = vector.shape_cast %50 : vector<1x2x1xf32> to vector<2x1xf32>
    %52 = vector.broadcast %51 : vector<2x1xf32> to vector<2x32xf32>
    %53 = arith.mulf %52, %49 : vector<2x32xf32>
    %54 = vector.broadcast %51 : vector<2x1xf32> to vector<2x32xf32>
    %55 = arith.mulf %54, %49 : vector<2x32xf32>
    %cst_18 = arith.constant 1.000000e+00 : f32
    %56 = vector.broadcast %cst_18 : f32 to vector<2x1xf32>
    %57 = arith.subf %56, %51 : vector<2x1xf32>
    %58 = vector.broadcast %57 : vector<2x1xf32> to vector<2x32xf32>
    %59 = arith.mulf %58, %17 : vector<2x32xf32>
    %60 = arith.addf %55, %59 : vector<2x32xf32>
    %61 = vector.extract_strided_slice %6 {offsets = [1, 0, 0], sizes = [1, 2, 96], strides = [1, 1, 1]} : vector<8x2x96xf32> to vector<1x2x96xf32>
    %62 = vector.shape_cast %61 : vector<1x2x96xf32> to vector<2x96xf32>
    %63 = arith.truncf %60 : vector<2x32xf32> to vector<2x32xbf16>
    %cst_19 = arith.constant dense<0.000000e+00> : vector<2x96xf32>
    %64 = tpu.matmul %63, %15, %cst_19 {dimension_numbers = #tpu.dot_dimension_numbers<[1], [0], [0], [1], [0, 0, 1, 1], [], []>} : vector<2x32xbf16>, vector<32x96xbf16>, vector<2x96xf32> -> vector<2x96xf32>
    %65 = vector.extract_strided_slice %62 {offsets = [0, 0], sizes = [2, 32], strides = [1, 1]} : vector<2x96xf32> to vector<2x32xf32>
    %66 = vector.extract_strided_slice %64 {offsets = [0, 0], sizes = [2, 32], strides = [1, 1]} : vector<2x96xf32> to vector<2x32xf32>
    %67 = arith.addf %65, %66 : vector<2x32xf32>
    %68 = arith.negf %67 : vector<2x32xf32>
    %69 = math.exp %68 : vector<2x32xf32>
    %cst_20 = arith.constant 1.000000e+00 : f32
    %70 = vector.broadcast %cst_20 : f32 to vector<2x32xf32>
    %71 = arith.addf %70, %69 : vector<2x32xf32>
    %72 = arith.divf %70, %71 : vector<2x32xf32>
    %73 = vector.extract_strided_slice %62 {offsets = [0, 32], sizes = [2, 32], strides = [1, 1]} : vector<2x96xf32> to vector<2x32xf32>
    %74 = vector.extract_strided_slice %64 {offsets = [0, 32], sizes = [2, 32], strides = [1, 1]} : vector<2x96xf32> to vector<2x32xf32>
    %75 = arith.addf %73, %74 : vector<2x32xf32>
    %76 = arith.negf %75 : vector<2x32xf32>
    %77 = math.exp %76 : vector<2x32xf32>
    %cst_21 = arith.constant 1.000000e+00 : f32
    %78 = vector.broadcast %cst_21 : f32 to vector<2x32xf32>
    %79 = arith.addf %78, %77 : vector<2x32xf32>
    %80 = arith.divf %78, %79 : vector<2x32xf32>
    %81 = vector.extract_strided_slice %62 {offsets = [0, 64], sizes = [2, 32], strides = [1, 1]} : vector<2x96xf32> to vector<2x32xf32>
    %82 = vector.extract_strided_slice %64 {offsets = [0, 64], sizes = [2, 32], strides = [1, 1]} : vector<2x96xf32> to vector<2x32xf32>
    %83 = vector.broadcast %16 : vector<1x32xf32> to vector<2x32xf32>
    %84 = arith.addf %82, %83 : vector<2x32xf32>
    %85 = arith.mulf %72, %84 : vector<2x32xf32>
    %86 = arith.addf %81, %85 : vector<2x32xf32>
    %87 = math.tanh %86 : vector<2x32xf32>
    %cst_22 = arith.constant 1.000000e+00 : f32
    %88 = vector.broadcast %cst_22 : f32 to vector<2x32xf32>
    %89 = arith.subf %88, %80 : vector<2x32xf32>
    %90 = arith.mulf %89, %87 : vector<2x32xf32>
    %91 = arith.mulf %80, %60 : vector<2x32xf32>
    %92 = arith.addf %90, %91 : vector<2x32xf32>
    %93 = vector.extract_strided_slice %14 {offsets = [1, 0, 0], sizes = [1, 2, 1], strides = [1, 1, 1]} : vector<8x2x1xf32> to vector<1x2x1xf32>
    %94 = vector.shape_cast %93 : vector<1x2x1xf32> to vector<2x1xf32>
    %95 = vector.broadcast %94 : vector<2x1xf32> to vector<2x32xf32>
    %96 = arith.mulf %95, %92 : vector<2x32xf32>
    %97 = vector.broadcast %94 : vector<2x1xf32> to vector<2x32xf32>
    %98 = arith.mulf %97, %92 : vector<2x32xf32>
    %cst_23 = arith.constant 1.000000e+00 : f32
    %99 = vector.broadcast %cst_23 : f32 to vector<2x1xf32>
    %100 = arith.subf %99, %94 : vector<2x1xf32>
    %101 = vector.broadcast %100 : vector<2x1xf32> to vector<2x32xf32>
    %102 = arith.mulf %101, %60 : vector<2x32xf32>
    %103 = arith.addf %98, %102 : vector<2x32xf32>
    %104 = vector.extract_strided_slice %6 {offsets = [2, 0, 0], sizes = [1, 2, 96], strides = [1, 1, 1]} : vector<8x2x96xf32> to vector<1x2x96xf32>
    %105 = vector.shape_cast %104 : vector<1x2x96xf32> to vector<2x96xf32>
    %106 = arith.truncf %103 : vector<2x32xf32> to vector<2x32xbf16>
    %cst_24 = arith.constant dense<0.000000e+00> : vector<2x96xf32>
    %107 = tpu.matmul %106, %15, %cst_24 {dimension_numbers = #tpu.dot_dimension_numbers<[1], [0], [0], [1], [0, 0, 1, 1], [], []>} : vector<2x32xbf16>, vector<32x96xbf16>, vector<2x96xf32> -> vector<2x96xf32>
    %108 = vector.extract_strided_slice %105 {offsets = [0, 0], sizes = [2, 32], strides = [1, 1]} : vector<2x96xf32> to vector<2x32xf32>
    %109 = vector.extract_strided_slice %107 {offsets = [0, 0], sizes = [2, 32], strides = [1, 1]} : vector<2x96xf32> to vector<2x32xf32>
    %110 = arith.addf %108, %109 : vector<2x32xf32>
    %111 = arith.negf %110 : vector<2x32xf32>
    %112 = math.exp %111 : vector<2x32xf32>
    %cst_25 = arith.constant 1.000000e+00 : f32
    %113 = vector.broadcast %cst_25 : f32 to vector<2x32xf32>
    %114 = arith.addf %113, %112 : vector<2x32xf32>
    %115 = arith.divf %113, %114 : vector<2x32xf32>
    %116 = vector.extract_strided_slice %105 {offsets = [0, 32], sizes = [2, 32], strides = [1, 1]} : vector<2x96xf32> to vector<2x32xf32>
    %117 = vector.extract_strided_slice %107 {offsets = [0, 32], sizes = [2, 32], strides = [1, 1]} : vector<2x96xf32> to vector<2x32xf32>
    %118 = arith.addf %116, %117 : vector<2x32xf32>
    %119 = arith.negf %118 : vector<2x32xf32>
    %120 = math.exp %119 : vector<2x32xf32>
    %cst_26 = arith.constant 1.000000e+00 : f32
    %121 = vector.broadcast %cst_26 : f32 to vector<2x32xf32>
    %122 = arith.addf %121, %120 : vector<2x32xf32>
    %123 = arith.divf %121, %122 : vector<2x32xf32>
    %124 = vector.extract_strided_slice %105 {offsets = [0, 64], sizes = [2, 32], strides = [1, 1]} : vector<2x96xf32> to vector<2x32xf32>
    %125 = vector.extract_strided_slice %107 {offsets = [0, 64], sizes = [2, 32], strides = [1, 1]} : vector<2x96xf32> to vector<2x32xf32>
    %126 = vector.broadcast %16 : vector<1x32xf32> to vector<2x32xf32>
    %127 = arith.addf %125, %126 : vector<2x32xf32>
    %128 = arith.mulf %115, %127 : vector<2x32xf32>
    %129 = arith.addf %124, %128 : vector<2x32xf32>
    %130 = math.tanh %129 : vector<2x32xf32>
    %cst_27 = arith.constant 1.000000e+00 : f32
    %131 = vector.broadcast %cst_27 : f32 to vector<2x32xf32>
    %132 = arith.subf %131, %123 : vector<2x32xf32>
    %133 = arith.mulf %132, %130 : vector<2x32xf32>
    %134 = arith.mulf %123, %103 : vector<2x32xf32>
    %135 = arith.addf %133, %134 : vector<2x32xf32>
    %136 = vector.extract_strided_slice %14 {offsets = [2, 0, 0], sizes = [1, 2, 1], strides = [1, 1, 1]} : vector<8x2x1xf32> to vector<1x2x1xf32>
    %137 = vector.shape_cast %136 : vector<1x2x1xf32> to vector<2x1xf32>
    %138 = vector.broadcast %137 : vector<2x1xf32> to vector<2x32xf32>
    %139 = arith.mulf %138, %135 : vector<2x32xf32>
    %140 = vector.broadcast %137 : vector<2x1xf32> to vector<2x32xf32>
    %141 = arith.mulf %140, %135 : vector<2x32xf32>
    %cst_28 = arith.constant 1.000000e+00 : f32
    %142 = vector.broadcast %cst_28 : f32 to vector<2x1xf32>
    %143 = arith.subf %142, %137 : vector<2x1xf32>
    %144 = vector.broadcast %143 : vector<2x1xf32> to vector<2x32xf32>
    %145 = arith.mulf %144, %103 : vector<2x32xf32>
    %146 = arith.addf %141, %145 : vector<2x32xf32>
    %147 = vector.extract_strided_slice %6 {offsets = [3, 0, 0], sizes = [1, 2, 96], strides = [1, 1, 1]} : vector<8x2x96xf32> to vector<1x2x96xf32>
    %148 = vector.shape_cast %147 : vector<1x2x96xf32> to vector<2x96xf32>
    %149 = arith.truncf %146 : vector<2x32xf32> to vector<2x32xbf16>
    %cst_29 = arith.constant dense<0.000000e+00> : vector<2x96xf32>
    %150 = tpu.matmul %149, %15, %cst_29 {dimension_numbers = #tpu.dot_dimension_numbers<[1], [0], [0], [1], [0, 0, 1, 1], [], []>} : vector<2x32xbf16>, vector<32x96xbf16>, vector<2x96xf32> -> vector<2x96xf32>
    %151 = vector.extract_strided_slice %148 {offsets = [0, 0], sizes = [2, 32], strides = [1, 1]} : vector<2x96xf32> to vector<2x32xf32>
    %152 = vector.extract_strided_slice %150 {offsets = [0, 0], sizes = [2, 32], strides = [1, 1]} : vector<2x96xf32> to vector<2x32xf32>
    %153 = arith.addf %151, %152 : vector<2x32xf32>
    %154 = arith.negf %153 : vector<2x32xf32>
    %155 = math.exp %154 : vector<2x32xf32>
    %cst_30 = arith.constant 1.000000e+00 : f32
    %156 = vector.broadcast %cst_30 : f32 to vector<2x32xf32>
    %157 = arith.addf %156, %155 : vector<2x32xf32>
    %158 = arith.divf %156, %157 : vector<2x32xf32>
    %159 = vector.extract_strided_slice %148 {offsets = [0, 32], sizes = [2, 32], strides = [1, 1]} : vector<2x96xf32> to vector<2x32xf32>
    %160 = vector.extract_strided_slice %150 {offsets = [0, 32], sizes = [2, 32], strides = [1, 1]} : vector<2x96xf32> to vector<2x32xf32>
    %161 = arith.addf %159, %160 : vector<2x32xf32>
    %162 = arith.negf %161 : vector<2x32xf32>
    %163 = math.exp %162 : vector<2x32xf32>
    %cst_31 = arith.constant 1.000000e+00 : f32
    %164 = vector.broadcast %cst_31 : f32 to vector<2x32xf32>
    %165 = arith.addf %164, %163 : vector<2x32xf32>
    %166 = arith.divf %164, %165 : vector<2x32xf32>
    %167 = vector.extract_strided_slice %148 {offsets = [0, 64], sizes = [2, 32], strides = [1, 1]} : vector<2x96xf32> to vector<2x32xf32>
    %168 = vector.extract_strided_slice %150 {offsets = [0, 64], sizes = [2, 32], strides = [1, 1]} : vector<2x96xf32> to vector<2x32xf32>
    %169 = vector.broadcast %16 : vector<1x32xf32> to vector<2x32xf32>
    %170 = arith.addf %168, %169 : vector<2x32xf32>
    %171 = arith.mulf %158, %170 : vector<2x32xf32>
    %172 = arith.addf %167, %171 : vector<2x32xf32>
    %173 = math.tanh %172 : vector<2x32xf32>
    %cst_32 = arith.constant 1.000000e+00 : f32
    %174 = vector.broadcast %cst_32 : f32 to vector<2x32xf32>
    %175 = arith.subf %174, %166 : vector<2x32xf32>
    %176 = arith.mulf %175, %173 : vector<2x32xf32>
    %177 = arith.mulf %166, %146 : vector<2x32xf32>
    %178 = arith.addf %176, %177 : vector<2x32xf32>
    %179 = vector.extract_strided_slice %14 {offsets = [3, 0, 0], sizes = [1, 2, 1], strides = [1, 1, 1]} : vector<8x2x1xf32> to vector<1x2x1xf32>
    %180 = vector.shape_cast %179 : vector<1x2x1xf32> to vector<2x1xf32>
    %181 = vector.broadcast %180 : vector<2x1xf32> to vector<2x32xf32>
    %182 = arith.mulf %181, %178 : vector<2x32xf32>
    %183 = vector.broadcast %180 : vector<2x1xf32> to vector<2x32xf32>
    %184 = arith.mulf %183, %178 : vector<2x32xf32>
    %cst_33 = arith.constant 1.000000e+00 : f32
    %185 = vector.broadcast %cst_33 : f32 to vector<2x1xf32>
    %186 = arith.subf %185, %180 : vector<2x1xf32>
    %187 = vector.broadcast %186 : vector<2x1xf32> to vector<2x32xf32>
    %188 = arith.mulf %187, %146 : vector<2x32xf32>
    %189 = arith.addf %184, %188 : vector<2x32xf32>
    %190 = vector.extract_strided_slice %6 {offsets = [4, 0, 0], sizes = [1, 2, 96], strides = [1, 1, 1]} : vector<8x2x96xf32> to vector<1x2x96xf32>
    %191 = vector.shape_cast %190 : vector<1x2x96xf32> to vector<2x96xf32>
    %192 = arith.truncf %189 : vector<2x32xf32> to vector<2x32xbf16>
    %cst_34 = arith.constant dense<0.000000e+00> : vector<2x96xf32>
    %193 = tpu.matmul %192, %15, %cst_34 {dimension_numbers = #tpu.dot_dimension_numbers<[1], [0], [0], [1], [0, 0, 1, 1], [], []>} : vector<2x32xbf16>, vector<32x96xbf16>, vector<2x96xf32> -> vector<2x96xf32>
    %194 = vector.extract_strided_slice %191 {offsets = [0, 0], sizes = [2, 32], strides = [1, 1]} : vector<2x96xf32> to vector<2x32xf32>
    %195 = vector.extract_strided_slice %193 {offsets = [0, 0], sizes = [2, 32], strides = [1, 1]} : vector<2x96xf32> to vector<2x32xf32>
    %196 = arith.addf %194, %195 : vector<2x32xf32>
    %197 = arith.negf %196 : vector<2x32xf32>
    %198 = math.exp %197 : vector<2x32xf32>
    %cst_35 = arith.constant 1.000000e+00 : f32
    %199 = vector.broadcast %cst_35 : f32 to vector<2x32xf32>
    %200 = arith.addf %199, %198 : vector<2x32xf32>
    %201 = arith.divf %199, %200 : vector<2x32xf32>
    %202 = vector.extract_strided_slice %191 {offsets = [0, 32], sizes = [2, 32], strides = [1, 1]} : vector<2x96xf32> to vector<2x32xf32>
    %203 = vector.extract_strided_slice %193 {offsets = [0, 32], sizes = [2, 32], strides = [1, 1]} : vector<2x96xf32> to vector<2x32xf32>
    %204 = arith.addf %202, %203 : vector<2x32xf32>
    %205 = arith.negf %204 : vector<2x32xf32>
    %206 = math.exp %205 : vector<2x32xf32>
    %cst_36 = arith.constant 1.000000e+00 : f32
    %207 = vector.broadcast %cst_36 : f32 to vector<2x32xf32>
    %208 = arith.addf %207, %206 : vector<2x32xf32>
    %209 = arith.divf %207, %208 : vector<2x32xf32>
    %210 = vector.extract_strided_slice %191 {offsets = [0, 64], sizes = [2, 32], strides = [1, 1]} : vector<2x96xf32> to vector<2x32xf32>
    %211 = vector.extract_strided_slice %193 {offsets = [0, 64], sizes = [2, 32], strides = [1, 1]} : vector<2x96xf32> to vector<2x32xf32>
    %212 = vector.broadcast %16 : vector<1x32xf32> to vector<2x32xf32>
    %213 = arith.addf %211, %212 : vector<2x32xf32>
    %214 = arith.mulf %201, %213 : vector<2x32xf32>
    %215 = arith.addf %210, %214 : vector<2x32xf32>
    %216 = math.tanh %215 : vector<2x32xf32>
    %cst_37 = arith.constant 1.000000e+00 : f32
    %217 = vector.broadcast %cst_37 : f32 to vector<2x32xf32>
    %218 = arith.subf %217, %209 : vector<2x32xf32>
    %219 = arith.mulf %218, %216 : vector<2x32xf32>
    %220 = arith.mulf %209, %189 : vector<2x32xf32>
    %221 = arith.addf %219, %220 : vector<2x32xf32>
    %222 = vector.extract_strided_slice %14 {offsets = [4, 0, 0], sizes = [1, 2, 1], strides = [1, 1, 1]} : vector<8x2x1xf32> to vector<1x2x1xf32>
    %223 = vector.shape_cast %222 : vector<1x2x1xf32> to vector<2x1xf32>
    %224 = vector.broadcast %223 : vector<2x1xf32> to vector<2x32xf32>
    %225 = arith.mulf %224, %221 : vector<2x32xf32>
    %226 = vector.broadcast %223 : vector<2x1xf32> to vector<2x32xf32>
    %227 = arith.mulf %226, %221 : vector<2x32xf32>
    %cst_38 = arith.constant 1.000000e+00 : f32
    %228 = vector.broadcast %cst_38 : f32 to vector<2x1xf32>
    %229 = arith.subf %228, %223 : vector<2x1xf32>
    %230 = vector.broadcast %229 : vector<2x1xf32> to vector<2x32xf32>
    %231 = arith.mulf %230, %189 : vector<2x32xf32>
    %232 = arith.addf %227, %231 : vector<2x32xf32>
    %233 = vector.extract_strided_slice %6 {offsets = [5, 0, 0], sizes = [1, 2, 96], strides = [1, 1, 1]} : vector<8x2x96xf32> to vector<1x2x96xf32>
    %234 = vector.shape_cast %233 : vector<1x2x96xf32> to vector<2x96xf32>
    %235 = arith.truncf %232 : vector<2x32xf32> to vector<2x32xbf16>
    %cst_39 = arith.constant dense<0.000000e+00> : vector<2x96xf32>
    %236 = tpu.matmul %235, %15, %cst_39 {dimension_numbers = #tpu.dot_dimension_numbers<[1], [0], [0], [1], [0, 0, 1, 1], [], []>} : vector<2x32xbf16>, vector<32x96xbf16>, vector<2x96xf32> -> vector<2x96xf32>
    %237 = vector.extract_strided_slice %234 {offsets = [0, 0], sizes = [2, 32], strides = [1, 1]} : vector<2x96xf32> to vector<2x32xf32>
    %238 = vector.extract_strided_slice %236 {offsets = [0, 0], sizes = [2, 32], strides = [1, 1]} : vector<2x96xf32> to vector<2x32xf32>
    %239 = arith.addf %237, %238 : vector<2x32xf32>
    %240 = arith.negf %239 : vector<2x32xf32>
    %241 = math.exp %240 : vector<2x32xf32>
    %cst_40 = arith.constant 1.000000e+00 : f32
    %242 = vector.broadcast %cst_40 : f32 to vector<2x32xf32>
    %243 = arith.addf %242, %241 : vector<2x32xf32>
    %244 = arith.divf %242, %243 : vector<2x32xf32>
    %245 = vector.extract_strided_slice %234 {offsets = [0, 32], sizes = [2, 32], strides = [1, 1]} : vector<2x96xf32> to vector<2x32xf32>
    %246 = vector.extract_strided_slice %236 {offsets = [0, 32], sizes = [2, 32], strides = [1, 1]} : vector<2x96xf32> to vector<2x32xf32>
    %247 = arith.addf %245, %246 : vector<2x32xf32>
    %248 = arith.negf %247 : vector<2x32xf32>
    %249 = math.exp %248 : vector<2x32xf32>
    %cst_41 = arith.constant 1.000000e+00 : f32
    %250 = vector.broadcast %cst_41 : f32 to vector<2x32xf32>
    %251 = arith.addf %250, %249 : vector<2x32xf32>
    %252 = arith.divf %250, %251 : vector<2x32xf32>
    %253 = vector.extract_strided_slice %234 {offsets = [0, 64], sizes = [2, 32], strides = [1, 1]} : vector<2x96xf32> to vector<2x32xf32>
    %254 = vector.extract_strided_slice %236 {offsets = [0, 64], sizes = [2, 32], strides = [1, 1]} : vector<2x96xf32> to vector<2x32xf32>
    %255 = vector.broadcast %16 : vector<1x32xf32> to vector<2x32xf32>
    %256 = arith.addf %254, %255 : vector<2x32xf32>
    %257 = arith.mulf %244, %256 : vector<2x32xf32>
    %258 = arith.addf %253, %257 : vector<2x32xf32>
    %259 = math.tanh %258 : vector<2x32xf32>
    %cst_42 = arith.constant 1.000000e+00 : f32
    %260 = vector.broadcast %cst_42 : f32 to vector<2x32xf32>
    %261 = arith.subf %260, %252 : vector<2x32xf32>
    %262 = arith.mulf %261, %259 : vector<2x32xf32>
    %263 = arith.mulf %252, %232 : vector<2x32xf32>
    %264 = arith.addf %262, %263 : vector<2x32xf32>
    %265 = vector.extract_strided_slice %14 {offsets = [5, 0, 0], sizes = [1, 2, 1], strides = [1, 1, 1]} : vector<8x2x1xf32> to vector<1x2x1xf32>
    %266 = vector.shape_cast %265 : vector<1x2x1xf32> to vector<2x1xf32>
    %267 = vector.broadcast %266 : vector<2x1xf32> to vector<2x32xf32>
    %268 = arith.mulf %267, %264 : vector<2x32xf32>
    %269 = vector.broadcast %266 : vector<2x1xf32> to vector<2x32xf32>
    %270 = arith.mulf %269, %264 : vector<2x32xf32>
    %cst_43 = arith.constant 1.000000e+00 : f32
    %271 = vector.broadcast %cst_43 : f32 to vector<2x1xf32>
    %272 = arith.subf %271, %266 : vector<2x1xf32>
    %273 = vector.broadcast %272 : vector<2x1xf32> to vector<2x32xf32>
    %274 = arith.mulf %273, %232 : vector<2x32xf32>
    %275 = arith.addf %270, %274 : vector<2x32xf32>
    %276 = vector.extract_strided_slice %6 {offsets = [6, 0, 0], sizes = [1, 2, 96], strides = [1, 1, 1]} : vector<8x2x96xf32> to vector<1x2x96xf32>
    %277 = vector.shape_cast %276 : vector<1x2x96xf32> to vector<2x96xf32>
    %278 = arith.truncf %275 : vector<2x32xf32> to vector<2x32xbf16>
    %cst_44 = arith.constant dense<0.000000e+00> : vector<2x96xf32>
    %279 = tpu.matmul %278, %15, %cst_44 {dimension_numbers = #tpu.dot_dimension_numbers<[1], [0], [0], [1], [0, 0, 1, 1], [], []>} : vector<2x32xbf16>, vector<32x96xbf16>, vector<2x96xf32> -> vector<2x96xf32>
    %280 = vector.extract_strided_slice %277 {offsets = [0, 0], sizes = [2, 32], strides = [1, 1]} : vector<2x96xf32> to vector<2x32xf32>
    %281 = vector.extract_strided_slice %279 {offsets = [0, 0], sizes = [2, 32], strides = [1, 1]} : vector<2x96xf32> to vector<2x32xf32>
    %282 = arith.addf %280, %281 : vector<2x32xf32>
    %283 = arith.negf %282 : vector<2x32xf32>
    %284 = math.exp %283 : vector<2x32xf32>
    %cst_45 = arith.constant 1.000000e+00 : f32
    %285 = vector.broadcast %cst_45 : f32 to vector<2x32xf32>
    %286 = arith.addf %285, %284 : vector<2x32xf32>
    %287 = arith.divf %285, %286 : vector<2x32xf32>
    %288 = vector.extract_strided_slice %277 {offsets = [0, 32], sizes = [2, 32], strides = [1, 1]} : vector<2x96xf32> to vector<2x32xf32>
    %289 = vector.extract_strided_slice %279 {offsets = [0, 32], sizes = [2, 32], strides = [1, 1]} : vector<2x96xf32> to vector<2x32xf32>
    %290 = arith.addf %288, %289 : vector<2x32xf32>
    %291 = arith.negf %290 : vector<2x32xf32>
    %292 = math.exp %291 : vector<2x32xf32>
    %cst_46 = arith.constant 1.000000e+00 : f32
    %293 = vector.broadcast %cst_46 : f32 to vector<2x32xf32>
    %294 = arith.addf %293, %292 : vector<2x32xf32>
    %295 = arith.divf %293, %294 : vector<2x32xf32>
    %296 = vector.extract_strided_slice %277 {offsets = [0, 64], sizes = [2, 32], strides = [1, 1]} : vector<2x96xf32> to vector<2x32xf32>
    %297 = vector.extract_strided_slice %279 {offsets = [0, 64], sizes = [2, 32], strides = [1, 1]} : vector<2x96xf32> to vector<2x32xf32>
    %298 = vector.broadcast %16 : vector<1x32xf32> to vector<2x32xf32>
    %299 = arith.addf %297, %298 : vector<2x32xf32>
    %300 = arith.mulf %287, %299 : vector<2x32xf32>
    %301 = arith.addf %296, %300 : vector<2x32xf32>
    %302 = math.tanh %301 : vector<2x32xf32>
    %cst_47 = arith.constant 1.000000e+00 : f32
    %303 = vector.broadcast %cst_47 : f32 to vector<2x32xf32>
    %304 = arith.subf %303, %295 : vector<2x32xf32>
    %305 = arith.mulf %304, %302 : vector<2x32xf32>
    %306 = arith.mulf %295, %275 : vector<2x32xf32>
    %307 = arith.addf %305, %306 : vector<2x32xf32>
    %308 = vector.extract_strided_slice %14 {offsets = [6, 0, 0], sizes = [1, 2, 1], strides = [1, 1, 1]} : vector<8x2x1xf32> to vector<1x2x1xf32>
    %309 = vector.shape_cast %308 : vector<1x2x1xf32> to vector<2x1xf32>
    %310 = vector.broadcast %309 : vector<2x1xf32> to vector<2x32xf32>
    %311 = arith.mulf %310, %307 : vector<2x32xf32>
    %312 = vector.broadcast %309 : vector<2x1xf32> to vector<2x32xf32>
    %313 = arith.mulf %312, %307 : vector<2x32xf32>
    %cst_48 = arith.constant 1.000000e+00 : f32
    %314 = vector.broadcast %cst_48 : f32 to vector<2x1xf32>
    %315 = arith.subf %314, %309 : vector<2x1xf32>
    %316 = vector.broadcast %315 : vector<2x1xf32> to vector<2x32xf32>
    %317 = arith.mulf %316, %275 : vector<2x32xf32>
    %318 = arith.addf %313, %317 : vector<2x32xf32>
    %319 = vector.extract_strided_slice %6 {offsets = [7, 0, 0], sizes = [1, 2, 96], strides = [1, 1, 1]} : vector<8x2x96xf32> to vector<1x2x96xf32>
    %320 = vector.shape_cast %319 : vector<1x2x96xf32> to vector<2x96xf32>
    %321 = arith.truncf %318 : vector<2x32xf32> to vector<2x32xbf16>
    %cst_49 = arith.constant dense<0.000000e+00> : vector<2x96xf32>
    %322 = tpu.matmul %321, %15, %cst_49 {dimension_numbers = #tpu.dot_dimension_numbers<[1], [0], [0], [1], [0, 0, 1, 1], [], []>} : vector<2x32xbf16>, vector<32x96xbf16>, vector<2x96xf32> -> vector<2x96xf32>
    %323 = vector.extract_strided_slice %320 {offsets = [0, 0], sizes = [2, 32], strides = [1, 1]} : vector<2x96xf32> to vector<2x32xf32>
    %324 = vector.extract_strided_slice %322 {offsets = [0, 0], sizes = [2, 32], strides = [1, 1]} : vector<2x96xf32> to vector<2x32xf32>
    %325 = arith.addf %323, %324 : vector<2x32xf32>
    %326 = arith.negf %325 : vector<2x32xf32>
    %327 = math.exp %326 : vector<2x32xf32>
    %cst_50 = arith.constant 1.000000e+00 : f32
    %328 = vector.broadcast %cst_50 : f32 to vector<2x32xf32>
    %329 = arith.addf %328, %327 : vector<2x32xf32>
    %330 = arith.divf %328, %329 : vector<2x32xf32>
    %331 = vector.extract_strided_slice %320 {offsets = [0, 32], sizes = [2, 32], strides = [1, 1]} : vector<2x96xf32> to vector<2x32xf32>
    %332 = vector.extract_strided_slice %322 {offsets = [0, 32], sizes = [2, 32], strides = [1, 1]} : vector<2x96xf32> to vector<2x32xf32>
    %333 = arith.addf %331, %332 : vector<2x32xf32>
    %334 = arith.negf %333 : vector<2x32xf32>
    %335 = math.exp %334 : vector<2x32xf32>
    %cst_51 = arith.constant 1.000000e+00 : f32
    %336 = vector.broadcast %cst_51 : f32 to vector<2x32xf32>
    %337 = arith.addf %336, %335 : vector<2x32xf32>
    %338 = arith.divf %336, %337 : vector<2x32xf32>
    %339 = vector.extract_strided_slice %320 {offsets = [0, 64], sizes = [2, 32], strides = [1, 1]} : vector<2x96xf32> to vector<2x32xf32>
    %340 = vector.extract_strided_slice %322 {offsets = [0, 64], sizes = [2, 32], strides = [1, 1]} : vector<2x96xf32> to vector<2x32xf32>
    %341 = vector.broadcast %16 : vector<1x32xf32> to vector<2x32xf32>
    %342 = arith.addf %340, %341 : vector<2x32xf32>
    %343 = arith.mulf %330, %342 : vector<2x32xf32>
    %344 = arith.addf %339, %343 : vector<2x32xf32>
    %345 = math.tanh %344 : vector<2x32xf32>
    %cst_52 = arith.constant 1.000000e+00 : f32
    %346 = vector.broadcast %cst_52 : f32 to vector<2x32xf32>
    %347 = arith.subf %346, %338 : vector<2x32xf32>
    %348 = arith.mulf %347, %345 : vector<2x32xf32>
    %349 = arith.mulf %338, %318 : vector<2x32xf32>
    %350 = arith.addf %348, %349 : vector<2x32xf32>
    %351 = vector.extract_strided_slice %14 {offsets = [7, 0, 0], sizes = [1, 2, 1], strides = [1, 1, 1]} : vector<8x2x1xf32> to vector<1x2x1xf32>
    %352 = vector.shape_cast %351 : vector<1x2x1xf32> to vector<2x1xf32>
    %353 = vector.broadcast %352 : vector<2x1xf32> to vector<2x32xf32>
    %354 = arith.mulf %353, %350 : vector<2x32xf32>
    %355 = vector.broadcast %352 : vector<2x1xf32> to vector<2x32xf32>
    %356 = arith.mulf %355, %350 : vector<2x32xf32>
    %cst_53 = arith.constant 1.000000e+00 : f32
    %357 = vector.broadcast %cst_53 : f32 to vector<2x1xf32>
    %358 = arith.subf %357, %352 : vector<2x1xf32>
    %359 = vector.broadcast %358 : vector<2x1xf32> to vector<2x32xf32>
    %360 = arith.mulf %359, %318 : vector<2x32xf32>
    %361 = arith.addf %356, %360 : vector<2x32xf32>
    %c0_54 = arith.constant 0 : index
    %c0_55 = arith.constant 0 : index
    %362 = vector.load %arg17[%c0_54, %c0_55] : memref<2x32xf32, #tpu.memory_space<vmem>>, vector<2x32xf32>
    tpu.vector_store %arg17[%c0_54, %c0_55], %361 {strides = array<i32>} : memref<2x32xf32, #tpu.memory_space<vmem>>, vector<2x32xf32>,
    %363 = vector.shape_cast %53 : vector<2x32xf32> to vector<2x1x32xf32>
    %364 = vector.shape_cast %96 : vector<2x32xf32> to vector<2x1x32xf32>
    %365 = vector.shape_cast %139 : vector<2x32xf32> to vector<2x1x32xf32>
    %366 = vector.shape_cast %182 : vector<2x32xf32> to vector<2x1x32xf32>
    %367 = vector.shape_cast %225 : vector<2x32xf32> to vector<2x1x32xf32>
    %368 = vector.shape_cast %268 : vector<2x32xf32> to vector<2x1x32xf32>
    %369 = vector.shape_cast %311 : vector<2x32xf32> to vector<2x1x32xf32>
    %370 = vector.shape_cast %354 : vector<2x32xf32> to vector<2x1x32xf32>
    %371 = tpu.concatenate %363, %364, %365, %366, %367, %368, %369, %370 in 1 : vector<2x1x32xf32>, vector<2x1x32xf32>, vector<2x1x32xf32>, vector<2x1x32xf32>, vector<2x1x32xf32>, vector<2x1x32xf32>, vector<2x1x32xf32>, vector<2x1x32xf32> -> vector<2x8x32xf32>
    %c0_56 = arith.constant 0 : index
    %c0_57 = arith.constant 0 : index
    %c0_58 = arith.constant 0 : index
    %372 = vector.load %arg3[%c0_56, %c0_57, %c0_58] : memref<2x128x32xbf16, #tpu.memory_space<vmem>>, vector<2x128x32xbf16>
    %c0_59 = arith.constant 0 : index
    %c0_60 = arith.constant 0 : index
    %373 = vector.load %arg8[%c0_59, %c0_60] : memref<32x32xbf16, #tpu.memory_space<vmem>>, vector<32x32xbf16>
    "tpu.trace_start"() <{level = 10 : i32, message = "bec,ch->beh"}> : () -> ()
    %cst_61 = arith.constant dense<0.000000e+00> : vector<2x128x32xf32>
    %374 = tpu.matmul %372, %373, %cst_61 {dimension_numbers = #tpu.dot_dimension_numbers<[2], [0], [0, 1], [1], [0, 0, 0, 1, 1, 1], [], []>} : vector<2x128x32xbf16>, vector<32x32xbf16>, vector<2x128x32xf32> -> vector<2x128x32xf32>
    "tpu.trace_stop"() : () -> ()
    %c0_62 = arith.constant 0 : index
    %c0_63 = arith.constant 0 : index
    %375 = vector.load %arg9[%c0_62, %c0_63] : memref<1x32xf32, #tpu.memory_space<vmem>>, vector<1x32xf32>
    %376 = vector.shape_cast %375 : vector<1x32xf32> to vector<1x1x32xf32>
    %377 = vector.broadcast %376 : vector<1x1x32xf32> to vector<2x128x32xf32>
    %378 = arith.addf %374, %377 : vector<2x128x32xf32>
    %379 = arith.truncf %371 : vector<2x8x32xf32> to vector<2x8x32xbf16>
    %380 = arith.truncf %378 : vector<2x128x32xf32> to vector<2x128x32xbf16>
    "tpu.trace_start"() <{level = 10 : i32, message = "btd,bed->bte"}> : () -> ()
    %cst_64 = arith.constant dense<0.000000e+00> : vector<2x8x128xf32>
    %381 = tpu.matmul %379, %380, %cst_64 {dimension_numbers = #tpu.dot_dimension_numbers<[2], [2], [1], [1], [0, 0, 0, 1, 1, 1], [0], [0]>} : vector<2x8x32xbf16>, vector<2x128x32xbf16>, vector<2x8x128xf32> -> vector<2x8x128xf32>
    "tpu.trace_stop"() : () -> ()
    %382 = tpu.iota {dimensions = array<i32: 2>} : vector<2x8x128xi32>
    %c10_i32 = arith.constant 10 : i32
    %383 = vector.broadcast %c10_i32 : i32 to vector<2x8x128xi32>
    %384 = arith.cmpi slt, %382, %383 : vector<2x8x128xi32>
    %cst_65 = arith.constant -1.000000e+30 : f32
    %385 = vector.broadcast %cst_65 : f32 to vector<2x8x128xf32>
    %386 = arith.select %384, %381, %385 : vector<2x8x128xi1>, vector<2x8x128xf32>
    %cst_66 = arith.constant dense<0xFF800000> : vector<2x8xf32>
    %387 = vector.multi_reduction <maximumf>, %386, %cst_66 [2] : vector<2x8x128xf32> to vector<2x8xf32>
    %388 = vector.shape_cast %387 : vector<2x8xf32> to vector<2x8x1xf32>
    %389 = vector.broadcast %388 : vector<2x8x1xf32> to vector<2x8x128xf32>
    %390 = arith.subf %386, %389 : vector<2x8x128xf32>
    %391 = math.exp %390 : vector<2x8x128xf32>
    %cst_67 = arith.constant dense<0.000000e+00> : vector<2x8xf32>
    %392 = vector.multi_reduction <add>, %391, %cst_67 [2] : vector<2x8x128xf32> to vector<2x8xf32>
    %393 = vector.shape_cast %392 : vector<2x8xf32> to vector<2x8x1xf32>
    %394 = vector.broadcast %393 : vector<2x8x1xf32> to vector<2x8x128xf32>
    %395 = arith.divf %391, %394 : vector<2x8x128xf32>
    %c0_68 = arith.constant 0 : index
    %c0_69 = arith.constant 0 : index
    %c0_70 = arith.constant 0 : index
    %396 = vector.load %arg16[%c0_68, %c0_69, %c0_70] : memref<2x8x128xf32, #tpu.memory_space<vmem>>, vector<2x8x128xf32>
    tpu.vector_store %arg16[%c0_68, %c0_69, %c0_70], %395 {strides = array<i32>} : memref<2x8x128xf32, #tpu.memory_space<vmem>>, vector<2x8x128xf32>,
    %397 = arith.truncf %395 : vector<2x8x128xf32> to vector<2x8x128xbf16>
    "tpu.trace_start"() <{level = 10 : i32, message = "bte,bec->btc"}> : () -> ()
    %cst_71 = arith.constant dense<0.000000e+00> : vector<2x8x32xf32>
    %398 = tpu.matmul %397, %372, %cst_71 {dimension_numbers = #tpu.dot_dimension_numbers<[2], [1], [1], [2], [0, 0, 0, 1, 1, 2], [0], [0]>} : vector<2x8x128xbf16>, vector<2x128x32xbf16>, vector<2x8x32xf32> -> vector<2x8x32xf32>
    "tpu.trace_stop"() : () -> ()
    %399 = vector.shape_cast %371 : vector<2x8x32xf32> to vector<16x32xf32>
    %400 = vector.shape_cast %398 : vector<2x8x32xf32> to vector<16x32xf32>
    %401 = arith.truncf %400 : vector<16x32xf32> to vector<16x32xbf16>
    %c0_72 = arith.constant 0 : index
    %c0_73 = arith.constant 0 : index
    %402 = vector.load %arg10[%c0_72, %c0_73] : memref<32x32xbf16, #tpu.memory_space<vmem>>, vector<32x32xbf16>
    %cst_74 = arith.constant dense<0.000000e+00> : vector<16x32xf32>
    %403 = tpu.matmul %401, %402, %cst_74 {dimension_numbers = #tpu.dot_dimension_numbers<[1], [0], [0], [1], [0, 0, 1, 1], [], []>} : vector<16x32xbf16>, vector<32x32xbf16>, vector<16x32xf32> -> vector<16x32xf32>
    %404 = arith.truncf %399 : vector<16x32xf32> to vector<16x32xbf16>
    %c0_75 = arith.constant 0 : index
    %c0_76 = arith.constant 0 : index
    %405 = vector.load %arg11[%c0_75, %c0_76] : memref<32x32xbf16, #tpu.memory_space<vmem>>, vector<32x32xbf16>
    %cst_77 = arith.constant dense<0.000000e+00> : vector<16x32xf32>
    %406 = tpu.matmul %404, %405, %cst_77 {dimension_numbers = #tpu.dot_dimension_numbers<[1], [0], [0], [1], [0, 0, 1, 1], [], []>} : vector<16x32xbf16>, vector<32x32xbf16>, vector<16x32xf32> -> vector<16x32xf32>
    %407 = arith.addf %403, %406 : vector<16x32xf32>
    %c0_78 = arith.constant 0 : index
    %c0_79 = arith.constant 0 : index
    %408 = vector.load %arg12[%c0_78, %c0_79] : memref<1x32xf32, #tpu.memory_space<vmem>>, vector<1x32xf32>
    %409 = vector.broadcast %408 : vector<1x32xf32> to vector<16x32xf32>
    %410 = arith.addf %407, %409 : vector<16x32xf32>
    %411 = math.tanh %410 : vector<16x32xf32>
    %412 = arith.truncf %411 : vector<16x32xf32> to vector<16x32xbf16>
    %c0_80 = arith.constant 0 : index
    %c0_81 = arith.constant 0 : index
    %413 = vector.load %arg13[%c0_80, %c0_81] : memref<32x128xbf16, #tpu.memory_space<vmem>>, vector<32x128xbf16>
    %cst_82 = arith.constant dense<0.000000e+00> : vector<16x128xf32>
    %414 = tpu.matmul %412, %413, %cst_82 {dimension_numbers = #tpu.dot_dimension_numbers<[1], [0], [0], [1], [0, 0, 1, 1], [], []>} : vector<16x32xbf16>, vector<32x128xbf16>, vector<16x128xf32> -> vector<16x128xf32>
    %c0_83 = arith.constant 0 : index
    %c0_84 = arith.constant 0 : index
    %415 = vector.load %arg14[%c0_83, %c0_84] : memref<1x128xf32, #tpu.memory_space<vmem>>, vector<1x128xf32>
    %416 = vector.broadcast %415 : vector<1x128xf32> to vector<16x128xf32>
    %417 = arith.addf %414, %416 : vector<16x128xf32>
    %cst_85 = arith.constant dense<0xFF800000> : vector<16xf32>
    %418 = vector.multi_reduction <maximumf>, %417, %cst_85 [1] : vector<16x128xf32> to vector<16xf32>
    %419 = vector.shape_cast %418 : vector<16xf32> to vector<16x1xf32>
    %420 = vector.broadcast %419 : vector<16x1xf32> to vector<16x128xf32>
    %421 = arith.subf %417, %420 : vector<16x128xf32>
    %422 = math.exp %421 : vector<16x128xf32>
    %cst_86 = arith.constant dense<0.000000e+00> : vector<16xf32>
    %423 = vector.multi_reduction <add>, %422, %cst_86 [1] : vector<16x128xf32> to vector<16xf32>
    %424 = vector.shape_cast %423 : vector<16xf32> to vector<16x1xf32>
    %425 = math.log %424 : vector<16x1xf32>
    %426 = arith.addf %425, %419 : vector<16x1xf32>
    %427 = vector.broadcast %426 : vector<16x1xf32> to vector<16x128xf32>
    %428 = arith.subf %417, %427 : vector<16x128xf32>
    %c0_87 = arith.constant 0 : index
    %c0_88 = arith.constant 0 : index
    %429 = vector.load %arg15[%c0_87, %c0_88] : memref<16x128xf32, #tpu.memory_space<vmem>>, vector<16x128xf32>
    tpu.vector_store %arg15[%c0_87, %c0_88], %428 {strides = array<i32>} : memref<16x128xf32, #tpu.memory_space<vmem>>, vector<16x128xf32>,
    return
  }
}

</mosaic_0001>

<bundles_post_ra>
// kernel: decoder_forward.1
= control target key start
LH: loop header
LB: loop body
LE: loop exit
PB: predicated region body
PF: predicated region fallthrough
CT: control target
= control target key end

     0   :  { %s3689_s0 = inlined_call_operand.vmem [shape: bf16[8,2,16], index: 0, kind: input, shape index: {}]   ;;  %s3690_s1 = inlined_call_operand.vmem [shape: f32[2,1], index: 1, kind: input, shape index: {}]   ;;  %s3691_s2 = inlined_call_operand.vmem [shape: f32[2,32], index: 2, kind: input, shape index: {}]   ;;  %s3692_s3 = inlined_call_operand.vmem [shape: bf16[2,128,32], index: 3, kind: input, shape index: {}]   ;;  %s3693_s4 = inlined_call_operand.vmem [shape: bf16[16,96], index: 4, kind: input, shape index: {}]   ;;  %s3694_s5 = inlined_call_operand.vmem [shape: bf16[32,96], index: 5, kind: input, shape index: {}]   ;;  %s3695_s6 = inlined_call_operand.vmem [shape: f32[1,96], index: 6, kind: input, shape index: {}]   ;;  %s3696_s7 = inlined_call_operand.vmem [shape: f32[1,32], index: 7, kind: input, shape index: {}]   ;;  %s3697_s8 = inlined_call_operand.vmem [shape: bf16[32,32], index: 8, kind: input, shape index: {}]   ;;  %s3698_s9 = inlined_call_operand.vmem [shape: f32[1,32], index: 9, kind: input, shape index: {}]   ;;  %s3699_s10 = inlined_call_operand.vmem [shape: bf16[32,32], index: 10, kind: input, shape index: {}]   ;;  %s3700_s11 = inlined_call_operand.vmem [shape: bf16[32,32], index: 11, kind: input, shape index: {}]   ;;  %s3701_s12 = inlined_call_operand.vmem [shape: f32[1,32], index: 12, kind: input, shape index: {}]   ;;  %s3702_s13 = inlined_call_operand.vmem [shape: bf16[32,128], index: 13, kind: input, shape index: {}]   ;;  %s3703_s14 = inlined_call_operand.vmem [shape: f32[1,128], index: 14, kind: input, shape index: {}]   ;;  %s3704_s15 = inlined_call_operand.hbm [shape: f32[16,128], index: 15, kind: output, shape index: {0}]   ;;  %s3705_s16 = inlined_call_operand.hbm [shape: f32[2,8,128], index: 16, kind: output, shape index: {1}]   ;;  %s3706_s17 = inlined_call_operand.hbm [shape: f32[2,32], index: 17, kind: output, shape index: {2}]  }
   0x1   :  { %3708 = sst [smem:[#allocation9_spill]] %s3689_s0 }
   0x2   :  { %3709 = sst [smem:[#allocation10_spill]] %s3690_s1 }
   0x3   :  { %23 = vsyncpa [#allocation3], 0  ;;  %v3045_v0 = vld [vmem:[%s3694_s5] sm:$0xff]   ;;  %v2939_v1 = vmov 0.0   ;;  %v3051_v2 = vld [vmem:[%s3694_s5 + $0x8] sm:$0xff]   ;;  %vm2940_vm0 = vmmov 0   ;;  %v87_v7 = vlaneseq }
   0x4   :  { %2555 = vmatprep.subr.bf16.mxu1 %v2939_v1  ;;  %2549 = vmatprep.subr.bf16.mxu0 %v2939_v1  ;;  %v3060_v3 = vld [vmem:[%s3691_s2] sm:$0x3]  ;;  %s3710_s19 = sld [smem:[#allocation9_spill]]  ;;  %vm286_vm1 = vcmask 261120   ;;  %v2941_v16 = vmov 1966171168  }
   0x5   :  { %2556 = vmatpush3.bf16.msra.mxu1 %v3045_v0  ;;  %2559 = vmatprep.mubr.msk.bf16.mxu1 %vm2940_vm0, %v2939_v1  ;;  %v2776_v4 = vld [vmem:[%s3693_s4] sm:$0xff]   ;;  %v273_v11 = vpack.c.bf16 %v3060_v3, %v3060_v3  ;;  %v85_v17 = vunpack.c.l.s4 %v2941_v16  ;;  %v3100_v18 = vshrl.u32 %v87_v7, 7  ;;  %s2942_s18 = smov 64   ;;  %vm145_vm2 = vcmask 130048  }
   0x6   :  { %2557 = vmatprep.subr.bf16.mxu1 %v2939_v1  ;;  %2551 = vmatprep.mubr.msk.bf16.mxu0 %vm2940_vm0, %v2939_v1  ;;  %v2397_v15 = vld [vmem:[%s3696_s7] ss:$0 sm:$0xff] }
   0x7   :  { %2550 = vmatpush3.bf16.msra.mxu0 %v2776_v4  ;;  %342 = vrot.lane.b32.xlu0 %v2397_v15, %s2942_s18  ;;  %v86_v23 = vunpack.c.0.s8 %v85_v17 }
   0x8   :  { %2563 = vmatprep.subr.bf16.mxu0 %v2939_v1 }
   0x9   :  { %2558 = vmatpush3.bf16.msra.mxu1 %v3051_v2  ;;  %v3109_v24 = vsub.s32 %v86_v23, %v3100_v18 }
   0xa   :  { %v56_v5 = vld [vmem:[%s3710_s19] sm:$0x1]  ;;  %v57_v6 = vld [vmem:[%s3710_s19 + $0x1] sm:$0x1]  ;;  %v58_v8 = vld [vmem:[%s3710_s19 + $0x2] sm:$0x1]  ;;  %2571 = vmatprep.subr.bf16.mxu1 %v2939_v1 }
   0xb   :  { %v59_v9 = vld [vmem:[%s3710_s19 + $0x3] sm:$0x1]  ;;  %v60_v10 = vld [vmem:[%s3710_s19 + $0x4] sm:$0x1]  ;;  %v61_v12 = vld [vmem:[%s3710_s19 + $0x5] sm:$0x1]  ;;  %v80_v19 = vcombine.low %v56_v5, %v57_v6 }
   0xc   :  { %v62_v13 = vld [vmem:[%s3710_s19 + $0x6] sm:$0x1]  ;;  %v63_v14 = vld [vmem:[%s3710_s19 + $0x7] sm:$0x1]  ;;  %2560 = vmatmul.mubr.msk.bf16.vlgmr.msra.gmra.mrb[0].mxu1 %vm286_vm1, %v273_v11  ;;  %v81_v20 = vcombine.low %v58_v8, %v59_v9  ;;  %v82_v21 = vcombine.low %v60_v10, %v61_v12 }
   0xd   :  { %v83_v22 = vcombine.low %v62_v13, %v63_v14  ;;  %2572 = vmatpush3.bf16.msra.mxu1 %v3045_v0  ;;  %2575 = vmatprep.mubr.msk.bf16.mxu1 %vm2940_vm0, %v2939_v1  ;;  %v90_v25 = vrot.slane %v80_v19, %v3109_v24 }
   0xe   :  { %2573 = vmatprep.subr.bf16.mxu1 %v2939_v1  ;;  %v97_v26 = vrot.slane %v81_v20, %v3109_v24  ;;  %v104_v27 = vrot.slane %v82_v21, %v3109_v24 }
   0xf   :  { %v111_v28 = vrot.slane %v83_v22, %v3109_v24 }
  0x10   :  { %v112_v29 = vcombine.low %v90_v25, %v97_v26 }
  0x11   :  { %2574 = vmatpush3.bf16.msra.mxu1 %v3051_v2  ;;  %v113_v30 = vcombine.low %v104_v27, %v111_v28 }
  0x12   :  { %2587 = vmatprep.subr.bf16.mxu1 %v2939_v1  ;;  %v120_v31 = vrot.slane %v112_v29, %v3109_v24 }
  0x13   :  { %v127_v32 = vrot.slane %v113_v30, %v3109_v24 }
  0x15   :  { %v128_v33 = vcombine.low %v120_v31, %v127_v32 }
  0x17   :  { %2552 = vmatmul.mubr.msk.bf16.vlgmr.msra.gmra.mrb[0].mxu0 %vm145_vm2, %v128_v33 }
  0x18   :  { %2564 = vmatpush3.bf16.msra.mxu0 %v3045_v0  ;;  %2567 = vmatprep.mubr.msk.bf16.mxu0 %vm2940_vm0, %v2939_v1 }
  0x19   :  { %2565 = vmatprep.subr.bf16.mxu0 %v2939_v1 }
  0x1a   :  { %24 = vsyncpa [#allocation5], 0  ;;  %v2943_v34 = vmov 1983009808   ;;  %v2374_v43 = vld [vmem:[%s3695_s6] ss:$0 sm:$0xff] }
  0x1b   :  { %v137_v35 = vunpack.c.l.s4 %v2943_v34  ;;  %v135_v46 = vcombine.low %v2374_v43, %v2374_v43  ;;  %s2944_s1 = smov 32   ;;  %s3711_s2 = sld [smem:[#allocation10_spill]]  ;;  %v2945_v5 = vmov 0   ;;  %vm1464_vm5 = vcmask 1040384  }
  0x1c   :  { %2566 = vmatpush3.bf16.msra.mxu0 %v3051_v2  ;;  %2772 = vset.pattern.permute.xlu1 %v2945_v5  ;;  %s2946_s21 = smov 96   ;;  %vm1467_vm7 = vcmask 1041408   ;;  %vm1470_vm9 = vcmask 1042432   ;;  %vm1473_vm11 = vcmask 1043456   ;;  %vm1476_vm13 = vcmask 1044480  }
  0x1d   :  { %2579 = vmatprep.subr.bf16.mxu0 %v2939_v1  ;;  %v138_v36 = vunpack.c.0.s8 %v137_v35  ;;  %2773 = vset.pattern.permute.xlu0 %v2945_v5  ;;  %v3180_v5 = vsub.s32 0, %v3100_v18  ;;  %vm1479_vm15 = vcmask 1045504  }
  0x1f   :  { %v3130_v38 = vsub.s32 %v138_v36, %v3100_v18 }
  0x21   :  { %v377_v47 = vrot.slane %v3060_v3, %v3130_v38  ;;  %v142_v48 = vrot.slane %v135_v46, %v3130_v38  ;;  %v3152_v4 = vld [vmem:[%s3711_s2] sm:$0x3] }
  0x22   :  { %vm2377_vm3 = vcmp.gt.f32.partialorder %v3152_v4, 0.0  ;;  %vm2378_vm4 = vcmp.gt.f32.partialorder %v3152_v4, 1.0  ;;  %vm2379_vm6 = vcmp.gt.f32.partialorder %v3152_v4, 2.0  ;;  %vm2380_vm8 = vcmp.gt.f32.partialorder %v3152_v4, 3.0 }
  0x23   :  { %v143_v50 = vcombine.low %v142_v48, %v142_v48  ;;  %v2385_v6 = vsel %vm2377_vm3, 1.0, %v2939_v1  ;;  %v2386_v43 = vsel %vm2378_vm4, 1.0, %v2939_v1  ;;  %vm2381_vm10 = vcmp.gt.f32.partialorder %v3152_v4, 4.0 }
  0x24   :  { %v400_v8 = vsub.f32 1.0, %v2385_v6  ;;  %vm2382_vm12 = vcmp.gt.f32.partialorder %v3152_v4, 5.0  ;;  %vm2383_vm14 = vcmp.gt.f32.partialorder %v3152_v4, 6.0  ;;  %vm2384_vm2 = vcmp.gt.f32.partialorder %v3152_v4, 7.0 }
  0x25   :  { %vm1482_vm3 = vcmask 1046528  }
  0x79   :  { %v3127_v37 = vpop.permute.xlu0 %342 }
  0xdf   :  { %v324_v39 = vpop.f32.mrb[0].mxu1 }
  0xe0   :  { %v345_v40 = vadd.f32 %v3127_v37, %v324_v39  ;;  %v2561_v41 = vpop.f32.mrb[1].mxu1 }
  0xe1   :  { %v327_v42 = vpop.f32.mrb[2].mxu1 }
  0xe2   :  { %v353_v44 = vrot.slane %v345_v40, %v3130_v38  ;;  %v2562_v45 = vpop.f32.mrb[3].mxu1 }
  0xe3   :  { %v514_v45 = vsub.f32 1.0, %v2386_v43 }
  0xe4   :  { %354 = vrot.lane.b32.xlu0 %v353_v44, %s2942_s18 }
  0xe8   :  { %378 = vrot.lane.b32.xlu0 %v377_v47, %s2944_s1 }
  0xea   :  { %v183_v49 = vpop.f32.mrb[0].mxu0 }
  0xeb   :  { %v2553_v51 = vpop.f32.mrb[1].mxu0  ;;  %v3144_v55 = vadd.f32 %v183_v49, %v143_v50 }
  0xec   :  { %v186_v52 = vpop.f32.mrb[2].mxu0  ;;  %403 = vperm.xlu0 %2773, %v400_v8  }
  0xed   :  { %v3142_v53 = vadd.f32 %v186_v52, %v143_v50  ;;  %v2554_v54 = vpop.f32.mrb[3].mxu0  ;;  %v199_v56 = vrot.slane %v3144_v55, %v3130_v38 }
  0xef   :  { %v330_v57 = vadd.f32 %v324_v39, %v199_v56  ;;  %v207_v33 = vcombine.high %v199_v56, %v199_v56 }
  0xf1   :  { %v2396_v58 = vmul.f32 -1.442695, %v330_v57 }
  0xf3   :  { %2801 = vpow2.f32 %v2396_v58 }
  0xfd   :  { %v2802_v59 = vpop.eup %2801 }
  0xfe   :  { %v334_v60 = vadd.f32 1.0, %v2802_v59 }
 0x100   :  { %2803 = vrcp.f32 %v334_v60 }
 0x10a   :  { %v2804_v61 = vpop.eup %2803 }
 0x10b   :  { %v364_v13 = vsub.f32 1.0, %v2804_v61 }
 0x156   :  { %v355_v62 = vpop.permute.xlu0 %354 }
 0x157   :  { %v357_v63 = vmul.f32 %v2804_v61, %v355_v62 }
 0x159   :  { %359 = vrot.lane.b32.xlu1 %v357_v63, %s2942_s18 }
 0x15a   :  { %v379_v12 = vpop.permute.xlu0 %378 }
 0x15b   :  { %v381_v15 = vmul.f32 %v2804_v61, %v379_v12 }
 0x16b   :  { %v404_v21 = vpop.permute.xlu0 %403 }
 0x16c   :  { %v406_v22 = vmul.f32 %v404_v21, %v3060_v3 }
 0x1cb   :  { %v360_v9 = vpop.permute.xlu1 %359 }
 0x1cc   :  { %v362_v10 = vadd.f32 %v360_v9, %v199_v56 }
 0x1ce   :  { %2805 = vtanh.f32 %v362_v10 }
 0x1d8   :  { %v2806_v11 = vpop.eup %2805 }
 0x1d9   :  { %366 = vrot.lane.b32.xlu1 %v2806_v11, %s2946_s21 }
 0x1dd   :  { %385 = vperm.xlu1 %2772, %v2385_v6  }
 0x24b   :  { %v367_v14 = vpop.permute.xlu1 %366 }
 0x24c   :  { %v369_v16 = vmul.f32 %v367_v14, %v364_v13 }
 0x24e   :  { %v382_v17 = vadd.f32 %v381_v15, %v369_v16 }
 0x250   :  { %v395_v19 = vrot.slane %v382_v17, %v3130_v38 }
 0x252   :  { %396 = vrot.lane.b32.xlu1 %v395_v19, %s2946_s21 }
 0x25c   :  { %v386_v20 = vpop.permute.xlu1 %385 }
 0x2c4   :  { %v397_v23 = vpop.permute.xlu1 %396 }
 0x2c5   :  { %v399_v25 = vmul.f32 %v397_v23, %v386_v20 }
 0x2c7   :  { %v407_v26 = vadd.f32 %v406_v22, %v399_v25  ;;  %v1215_v61 = vrot.slane %v399_v25, %v3109_v24 }
 0x2c9   :  { %v408_v27 = vpack.c.bf16 %v407_v26, %v407_v26  ;;  %v491_v44 = vrot.slane %v407_v26, %v3130_v38  ;;  %v1216_v9 = vcombine.high %v1215_v61, %v1215_v61  ;;  %v1223_v13 = vrot.slane %v1215_v61, %v3109_v24 }
 0x2cb   :  { %2568 = vmatmul.mubr.msk.bf16.vlgmr.msra.gmra.mrb[4].mxu0 %vm286_vm1, %v408_v27  ;;  %v1230_v18 = vrot.slane %v1216_v9, %v3109_v24  ;;  %v192_v27 = vcombine.high %v3144_v55, %v3144_v55 }
 0x2cc   :  { %2580 = vmatpush3.bf16.msra.mxu0 %v3045_v0  ;;  %2583 = vmatprep.mubr.msk.bf16.mxu0 %vm2940_vm0, %v2939_v1 }
 0x2cd   :  { %2581 = vmatprep.subr.bf16.mxu0 %v2939_v1 }
 0x2d0   :  { %2582 = vmatpush3.bf16.msra.mxu0 %v3051_v2 }
 0x2d1   :  { %2595 = vmatprep.subr.bf16.mxu0 %v2939_v1 }
 0x39e   :  { %v446_v28 = vpop.f32.mrb[4].mxu0 }
 0x39f   :  { %v459_v3 = vadd.f32 %v446_v28, %v3127_v37  ;;  %v2569_v29 = vpop.f32.mrb[5].mxu0  ;;  %v452_v34 = vadd.f32 %v446_v28, %v207_v33  ;;  %v206_v28 = vrot.slane %v192_v27, %v3130_v38 }
 0x3a0   :  { %v449_v30 = vpop.f32.mrb[6].mxu0 }
 0x3a1   :  { %v467_v31 = vrot.slane %v459_v3, %v3130_v38  ;;  %v2570_v32 = vpop.f32.mrb[7].mxu0  ;;  %v2399_v35 = vmul.f32 -1.442695, %v452_v34 }
 0x3a3   :  { %468 = vrot.lane.b32.xlu1 %v467_v31, %s2942_s18  ;;  %2807 = vpow2.f32 %v2399_v35  ;;  %v2387_v35 = vsel %vm2379_vm6, 1.0, %v2939_v1 }
 0x3a4   :  { %v628_v55 = vsub.f32 1.0, %v2387_v35 }
 0x3ad   :  { %v2808_v36 = vpop.eup %2807 }
 0x3ae   :  { %v456_v39 = vadd.f32 1.0, %v2808_v36 }
 0x3b0   :  { %2809 = vrcp.f32 %v456_v39 }
 0x3ba   :  { %v2810_v40 = vpop.eup %2809 }
 0x3bb   :  { %v478_v50 = vsub.f32 1.0, %v2810_v40 }
 0x415   :  { %v469_v41 = vpop.permute.xlu1 %468 }
 0x416   :  { %v471_v42 = vmul.f32 %v2810_v40, %v469_v41 }
 0x418   :  { %473 = vrot.lane.b32.xlu0 %v471_v42, %s2942_s18 }
 0x41c   :  { %492 = vrot.lane.b32.xlu0 %v491_v44, %s2944_s1 }
 0x420   :  { %517 = vperm.xlu0 %2773, %v514_v45  }
 0x48a   :  { %v474_v46 = vpop.permute.xlu0 %473 }
 0x48b   :  { %v476_v47 = vadd.f32 %v474_v46, %v207_v33 }
 0x48d   :  { %2811 = vtanh.f32 %v476_v47 }
 0x48e   :  { %v493_v49 = vpop.permute.xlu0 %492 }
 0x48f   :  { %v495_v52 = vmul.f32 %v2810_v40, %v493_v49 }
 0x497   :  { %v2812_v48 = vpop.eup %2811 }
 0x498   :  { %480 = vrot.lane.b32.xlu1 %v2812_v48, %s2946_s21 }
 0x49c   :  { %499 = vperm.xlu1 %2772, %v2386_v43  }
 0x49f   :  { %v518_v59 = vpop.permute.xlu0 %517 }
 0x4a0   :  { %v520_v62 = vmul.f32 %v518_v59, %v407_v26 }
 0x50a   :  { %v481_v51 = vpop.permute.xlu1 %480 }
 0x50b   :  { %v483_v54 = vmul.f32 %v481_v51, %v478_v50 }
 0x50d   :  { %v496_v56 = vadd.f32 %v495_v52, %v483_v54 }
 0x50f   :  { %v509_v57 = vrot.slane %v496_v56, %v3130_v38 }
 0x511   :  { %510 = vrot.lane.b32.xlu1 %v509_v57, %s2946_s21 }
 0x51b   :  { %v500_v58 = vpop.permute.xlu1 %499 }
 0x583   :  { %v511_v60 = vpop.permute.xlu1 %510 }
 0x584   :  { %v513_v63 = vmul.f32 %v511_v60, %v500_v58 }
 0x586   :  { %v521_v6 = vadd.f32 %v520_v62, %v513_v63  ;;  %v1240_v8 = vrot.slane %v513_v63, %v3109_v24 }
 0x588   :  { %v522_v10 = vpack.c.bf16 %v521_v6, %v521_v6  ;;  %v1241_v11 = vcombine.high %v1240_v8, %v1240_v8  ;;  %v1248_v12 = vrot.slane %v1240_v8, %v3109_v24  ;;  %v605_v36 = vrot.slane %v521_v6, %v3130_v38 }
 0x58a   :  { %v1255_v14 = vrot.slane %v1241_v11, %v3109_v24  ;;  %v1397_v15 = vrot.slane %v1248_v12, %v3180_v5  ;;  %2576 = vmatmul.mubr.msk.bf16.vlgmr.msra.gmra.mrb[4].mxu1 %vm286_vm1, %v522_v10 }
 0x58b   :  { %2588 = vmatpush3.bf16.msra.mxu1 %v3045_v0  ;;  %2591 = vmatprep.mubr.msk.bf16.mxu1 %vm2940_vm0, %v2939_v1 }
 0x58c   :  { %v1401_v16 = vrot.slane %v1255_v14, %v3180_v5  ;;  %v1465_v17 = vsel %vm1464_vm5, %v1223_v13, %v1397_v15  ;;  %2589 = vmatprep.subr.bf16.mxu1 %v2939_v1  ;;  %v208_v15 = vcombine.high %v206_v28, %v206_v28 }
 0x58e   :  { %v1466_v19 = vsel %vm1464_vm5, %v1230_v18, %v1401_v16 }
 0x58f   :  { %2590 = vmatpush3.bf16.msra.mxu1 %v3051_v2 }
 0x590   :  { %2603 = vmatprep.subr.bf16.mxu1 %v2939_v1 }
 0x65d   :  { %v560_v20 = vpop.f32.mrb[4].mxu1 }
 0x65e   :  { %v573_v21 = vadd.f32 %v560_v20, %v3127_v37  ;;  %v2577_v22 = vpop.f32.mrb[5].mxu1  ;;  %v566_v3 = vadd.f32 %v560_v20, %v206_v28 }
 0x65f   :  { %v563_v23 = vpop.f32.mrb[6].mxu1 }
 0x660   :  { %v581_v25 = vrot.slane %v573_v21, %v3130_v38  ;;  %v2578_v26 = vpop.f32.mrb[7].mxu1  ;;  %v2401_v29 = vmul.f32 -1.442695, %v566_v3  ;;  %v2388_v23 = vsel %vm2380_vm8, 1.0, %v2939_v1 }
 0x661   :  { %v742_v26 = vsub.f32 1.0, %v2388_v23 }
 0x662   :  { %582 = vrot.lane.b32.xlu0 %v581_v25, %s2942_s18  ;;  %2813 = vpow2.f32 %v2401_v29 }
 0x66c   :  { %v2814_v30 = vpop.eup %2813 }
 0x66d   :  { %v570_v31 = vadd.f32 1.0, %v2814_v30 }
 0x66f   :  { %2815 = vrcp.f32 %v570_v31 }
 0x679   :  { %v2816_v32 = vpop.eup %2815 }
 0x67a   :  { %v592_v43 = vsub.f32 1.0, %v2816_v32 }
 0x6d4   :  { %v583_v33 = vpop.permute.xlu0 %582 }
 0x6d5   :  { %v585_v34 = vmul.f32 %v2816_v32, %v583_v33 }
 0x6d7   :  { %587 = vrot.lane.b32.xlu1 %v585_v34, %s2942_s18 }
 0x6db   :  { %606 = vrot.lane.b32.xlu1 %v605_v36, %s2944_s1 }
 0x6df   :  { %631 = vperm.xlu1 %2772, %v628_v55  }
 0x749   :  { %v588_v39 = vpop.permute.xlu1 %587 }
 0x74a   :  { %v590_v40 = vadd.f32 %v588_v39, %v206_v28 }
 0x74c   :  { %2817 = vtanh.f32 %v590_v40 }
 0x74d   :  { %v607_v42 = vpop.permute.xlu1 %606 }
 0x74e   :  { %v609_v45 = vmul.f32 %v2816_v32, %v607_v42 }
 0x756   :  { %v2818_v41 = vpop.eup %2817 }
 0x757   :  { %594 = vrot.lane.b32.xlu0 %v2818_v41, %s2946_s21 }
 0x75b   :  { %613 = vperm.xlu0 %2773, %v2387_v35  }
 0x75e   :  { %v632_v50 = vpop.permute.xlu1 %631 }
 0x75f   :  { %v634_v52 = vmul.f32 %v632_v50, %v521_v6 }
 0x7c9   :  { %v595_v44 = vpop.permute.xlu0 %594 }
 0x7ca   :  { %v597_v46 = vmul.f32 %v595_v44, %v592_v43 }
 0x7cc   :  { %v610_v47 = vadd.f32 %v609_v45, %v597_v46 }
 0x7ce   :  { %v623_v48 = vrot.slane %v610_v47, %v3130_v38 }
 0x7d0   :  { %624 = vrot.lane.b32.xlu0 %v623_v48, %s2946_s21 }
 0x7da   :  { %v614_v49 = vpop.permute.xlu0 %613 }
 0x842   :  { %v625_v51 = vpop.permute.xlu0 %624 }
 0x843   :  { %v627_v54 = vmul.f32 %v625_v51, %v614_v49 }
 0x845   :  { %v635_v56 = vadd.f32 %v634_v52, %v627_v54  ;;  %v1263_v57 = vrot.slane %v627_v54, %v3109_v24 }
 0x847   :  { %v636_v58 = vpack.c.bf16 %v635_v56, %v635_v56  ;;  %v1264_v59 = vcombine.high %v1263_v57, %v1263_v57  ;;  %v1271_v60 = vrot.slane %v1263_v57, %v3109_v24  ;;  %v719_v25 = vrot.slane %v635_v56, %v3130_v38 }
 0x849   :  { %v1278_v61 = vrot.slane %v1264_v59, %v3109_v24  ;;  %v1407_v62 = vrot.slane %v1271_v60, %v3180_v5  ;;  %2584 = vmatmul.mubr.msk.bf16.vlgmr.msra.gmra.mrb[8].mxu0 %vm286_vm1, %v636_v58  ;;  %v216_v60 = vrot.slane %v3142_v53, %v3130_v38 }
 0x84a   :  { %2596 = vmatpush3.bf16.msra.mxu0 %v3045_v0  ;;  %2599 = vmatprep.mubr.msk.bf16.mxu0 %vm2940_vm0, %v2939_v1 }
 0x84b   :  { %v1411_v63 = vrot.slane %v1278_v61, %v3180_v5  ;;  %v1468_v6 = vsel %vm1467_vm7, %v1465_v17, %v1407_v62  ;;  %2597 = vmatprep.subr.bf16.mxu0 %v2939_v1 }
 0x84d   :  { %v1469_v8 = vsel %vm1467_vm7, %v1466_v19, %v1411_v63 }
 0x84e   :  { %2598 = vmatpush3.bf16.msra.mxu0 %v3051_v2 }
 0x84f   :  { %2611 = vmatprep.subr.bf16.mxu0 %v2939_v1 }
 0x91c   :  { %v674_v9 = vpop.f32.mrb[8].mxu0 }
 0x91d   :  { %v687_v10 = vadd.f32 %v674_v9, %v3127_v37  ;;  %v2585_v11 = vpop.f32.mrb[9].mxu0  ;;  %v680_v18 = vadd.f32 %v674_v9, %v208_v15 }
 0x91e   :  { %v677_v12 = vpop.f32.mrb[10].mxu0  ;;  %v2389_v11 = vsel %vm2381_vm10, 1.0, %v2939_v1 }
 0x91f   :  { %v695_v13 = vrot.slane %v687_v10, %v3130_v38  ;;  %v2586_v14 = vpop.f32.mrb[11].mxu0  ;;  %v2403_v16 = vmul.f32 -1.442695, %v680_v18 }
 0x921   :  { %696 = vrot.lane.b32.xlu1 %v695_v13, %s2942_s18  ;;  %2819 = vpow2.f32 %v2403_v16  ;;  %v856_v13 = vsub.f32 1.0, %v2389_v11 }
 0x92b   :  { %v2820_v17 = vpop.eup %2819 }
 0x92c   :  { %v684_v19 = vadd.f32 1.0, %v2820_v17 }
 0x92e   :  { %2821 = vrcp.f32 %v684_v19 }
 0x938   :  { %v2822_v20 = vpop.eup %2821 }
 0x939   :  { %v706_v30 = vsub.f32 1.0, %v2822_v20 }
 0x993   :  { %v697_v21 = vpop.permute.xlu1 %696 }
 0x994   :  { %v699_v22 = vmul.f32 %v2822_v20, %v697_v21 }
 0x996   :  { %701 = vrot.lane.b32.xlu0 %v699_v22, %s2942_s18 }
 0x99a   :  { %720 = vrot.lane.b32.xlu0 %v719_v25, %s2944_s1 }
 0x99e   :  { %745 = vperm.xlu0 %2773, %v742_v26  }
 0xa08   :  { %v702_v27 = vpop.permute.xlu0 %701 }
 0xa09   :  { %v704_v28 = vadd.f32 %v702_v27, %v208_v15 }
 0xa0b   :  { %2823 = vtanh.f32 %v704_v28 }
 0xa0c   :  { %v721_v29 = vpop.permute.xlu0 %720 }
 0xa0d   :  { %v723_v32 = vmul.f32 %v2822_v20, %v721_v29 }
 0xa15   :  { %v2824_v3 = vpop.eup %2823 }
 0xa16   :  { %708 = vrot.lane.b32.xlu1 %v2824_v3, %s2946_s21 }
 0xa1a   :  { %727 = vperm.xlu1 %2772, %v2388_v23  }
 0xa1d   :  { %v746_v55 = vpop.permute.xlu0 %745 }
 0xa1e   :  { %v748_v40 = vmul.f32 %v746_v55, %v635_v56 }
 0xa88   :  { %v709_v31 = vpop.permute.xlu1 %708 }
 0xa89   :  { %v711_v33 = vmul.f32 %v709_v31, %v706_v30 }
 0xa8b   :  { %v724_v34 = vadd.f32 %v723_v32, %v711_v33 }
 0xa8d   :  { %v737_v35 = vrot.slane %v724_v34, %v3130_v38 }
 0xa8f   :  { %738 = vrot.lane.b32.xlu1 %v737_v35, %s2946_s21 }
 0xa99   :  { %v728_v36 = vpop.permute.xlu1 %727 }
 0xb01   :  { %v739_v39 = vpop.permute.xlu1 %738 }
 0xb02   :  { %v741_v41 = vmul.f32 %v739_v39, %v728_v36 }
 0xb04   :  { %v749_v42 = vadd.f32 %v748_v40, %v741_v41  ;;  %v1286_v43 = vrot.slane %v741_v41, %v3109_v24 }
 0xb06   :  { %v750_v44 = vpack.c.bf16 %v749_v42, %v749_v42  ;;  %v1287_v45 = vcombine.high %v1286_v43, %v1286_v43  ;;  %v1294_v46 = vrot.slane %v1286_v43, %v3109_v24  ;;  %v833_v12 = vrot.slane %v749_v42, %v3130_v38 }
 0xb08   :  { %v1301_v47 = vrot.slane %v1287_v45, %v3109_v24  ;;  %v1417_v48 = vrot.slane %v1294_v46, %v3180_v5  ;;  %2592 = vmatmul.mubr.msk.bf16.vlgmr.msra.gmra.mrb[8].mxu1 %vm286_vm1, %v750_v44  ;;  %v224_v45 = vcombine.high %v216_v60, %v216_v60 }
 0xb09   :  { %2604 = vmatpush3.bf16.msra.mxu1 %v3045_v0  ;;  %2607 = vmatprep.mubr.msk.bf16.mxu1 %vm2940_vm0, %v2939_v1 }
 0xb0a   :  { %v1421_v49 = vrot.slane %v1301_v47, %v3180_v5  ;;  %v1471_v50 = vsel %vm1470_vm9, %v1468_v6, %v1417_v48  ;;  %2605 = vmatprep.subr.bf16.mxu1 %v2939_v1 }
 0xb0c   :  { %v1472_v51 = vsel %vm1470_vm9, %v1469_v8, %v1421_v49 }
 0xb0d   :  { %2606 = vmatpush3.bf16.msra.mxu1 %v3051_v2 }
 0xbdb   :  { %v788_v52 = vpop.f32.mrb[8].mxu1 }
 0xbdc   :  { %v801_v54 = vadd.f32 %v788_v52, %v3127_v37  ;;  %v2593_v56 = vpop.f32.mrb[9].mxu1  ;;  %v794_v61 = vadd.f32 %v788_v52, %v216_v60  ;;  %v2390_v52 = vsel %vm2382_vm12, 1.0, %v2939_v1 }
 0xbdd   :  { %v791_v57 = vpop.f32.mrb[10].mxu1  ;;  %v970_v56 = vsub.f32 1.0, %v2390_v52 }
 0xbde   :  { %v809_v58 = vrot.slane %v801_v54, %v3130_v38  ;;  %v2594_v59 = vpop.f32.mrb[11].mxu1  ;;  %v2405_v62 = vmul.f32 -1.442695, %v794_v61 }
 0xbe0   :  { %810 = vrot.lane.b32.xlu0 %v809_v58, %s2942_s18  ;;  %2825 = vpow2.f32 %v2405_v62 }
 0xbea   :  { %v2826_v63 = vpop.eup %2825 }
 0xbeb   :  { %v798_v6 = vadd.f32 1.0, %v2826_v63 }
 0xbed   :  { %2827 = vrcp.f32 %v798_v6 }
 0xbf7   :  { %v2828_v8 = vpop.eup %2827 }
 0xbf8   :  { %v820_v17 = vsub.f32 1.0, %v2828_v8 }
 0xc52   :  { %v811_v9 = vpop.permute.xlu0 %810 }
 0xc53   :  { %v813_v10 = vmul.f32 %v2828_v8, %v811_v9 }
 0xc55   :  { %815 = vrot.lane.b32.xlu1 %v813_v10, %s2942_s18 }
 0xc59   :  { %834 = vrot.lane.b32.xlu1 %v833_v12, %s2944_s1 }
 0xc5d   :  { %859 = vperm.xlu1 %2772, %v856_v13  }
 0xcc7   :  { %v816_v14 = vpop.permute.xlu1 %815 }
 0xcc8   :  { %v818_v15 = vadd.f32 %v816_v14, %v216_v60 }
 0xcca   :  { %2829 = vtanh.f32 %v818_v15 }
 0xccb   :  { %v835_v16 = vpop.permute.xlu1 %834 }
 0xccc   :  { %v837_v20 = vmul.f32 %v2828_v8, %v835_v16 }
 0xcd4   :  { %v2830_v18 = vpop.eup %2829 }
 0xcd5   :  { %822 = vrot.lane.b32.xlu0 %v2830_v18, %s2946_s21 }
 0xcd9   :  { %841 = vperm.xlu0 %2773, %v2389_v11  }
 0xcdc   :  { %v860_v26 = vpop.permute.xlu1 %859 }
 0xcdd   :  { %v862_v28 = vmul.f32 %v860_v26, %v749_v42 }
 0xd47   :  { %v823_v19 = vpop.permute.xlu0 %822 }
 0xd48   :  { %v825_v21 = vmul.f32 %v823_v19, %v820_v17 }
 0xd4a   :  { %v838_v22 = vadd.f32 %v837_v20, %v825_v21 }
 0xd4c   :  { %v851_v23 = vrot.slane %v838_v22, %v3130_v38 }
 0xd4e   :  { %852 = vrot.lane.b32.xlu0 %v851_v23, %s2946_s21 }
 0xd58   :  { %v842_v25 = vpop.permute.xlu0 %841 }
 0xdc0   :  { %v853_v27 = vpop.permute.xlu0 %852 }
 0xdc1   :  { %v855_v3 = vmul.f32 %v853_v27, %v842_v25 }
 0xdc3   :  { %v863_v29 = vadd.f32 %v862_v28, %v855_v3  ;;  %v1309_v30 = vrot.slane %v855_v3, %v3109_v24 }
 0xdc5   :  { %v864_v31 = vpack.c.bf16 %v863_v29, %v863_v29  ;;  %v1310_v32 = vcombine.high %v1309_v30, %v1309_v30  ;;  %v1317_v33 = vrot.slane %v1309_v30, %v3109_v24  ;;  %v947_v54 = vrot.slane %v863_v29, %v3130_v38 }
 0xdc7   :  { %v1324_v34 = vrot.slane %v1310_v32, %v3109_v24  ;;  %v1427_v35 = vrot.slane %v1317_v33, %v3180_v5  ;;  %2600 = vmatmul.mubr.msk.bf16.vlgmr.msra.gmra.mrb[12].mxu0 %vm286_vm1, %v864_v31  ;;  %v209_v31 = vcombine.high %v3142_v53, %v3142_v53 }
 0xdc8   :  { %2612 = vmatpush3.bf16.msra.mxu0 %v3045_v0  ;;  %2615 = vmatprep.mubr.msk.bf16.mxu0 %vm2940_vm0, %v2939_v1 }
 0xdc9   :  { %v1431_v36 = vrot.slane %v1324_v34, %v3180_v5  ;;  %v1474_v55 = vsel %vm1473_vm11, %v1471_v50, %v1427_v35  ;;  %2613 = vmatprep.subr.bf16.mxu0 %v2939_v1  ;;  %v3292_v32 = vrot.slane %v209_v31, %v3130_v38  ;;  %v3424_v31 = vld [vmem:[%s3692_s3 + $0x68] sm:$0xff]  }
 0xdcb   :  { %v1475_v39 = vsel %vm1473_vm11, %v1472_v51, %v1431_v36 }
 0xdcc   :  { %2614 = vmatpush3.bf16.msra.mxu0 %v3051_v2 }
 0xdcd   :  { %2655 = vmatprep.subr.bf16.mxu0 %v2939_v1 }
 0xe9a   :  { %v902_v40 = vpop.f32.mrb[12].mxu0 }
 0xe9b   :  { %v915_v41 = vadd.f32 %v902_v40, %v3127_v37  ;;  %v2601_v42 = vpop.f32.mrb[13].mxu0  ;;  %v908_v46 = vadd.f32 %v902_v40, %v224_v45 }
 0xe9c   :  { %v905_v43 = vpop.f32.mrb[14].mxu0 }
 0xe9d   :  { %v923_v0 = vrot.slane %v915_v41, %v3130_v38  ;;  %v2602_v44 = vpop.f32.mrb[15].mxu0  ;;  %v2407_v47 = vmul.f32 -1.442695, %v908_v46  ;;  %v2391_v41 = vsel %vm2383_vm14, 1.0, %v2939_v1 }
 0xe9e   :  { %v1084_v42 = vsub.f32 1.0, %v2391_v41 }
 0xe9f   :  { %924 = vrot.lane.b32.xlu1 %v923_v0, %s2942_s18  ;;  %2831 = vpow2.f32 %v2407_v47 }
 0xea9   :  { %v2832_v48 = vpop.eup %2831 }
 0xeaa   :  { %v912_v49 = vadd.f32 1.0, %v2832_v48 }
 0xeac   :  { %2833 = vrcp.f32 %v912_v49 }
 0xeb6   :  { %v2834_v2 = vpop.eup %2833 }
 0xeb7   :  { %v934_v61 = vsub.f32 1.0, %v2834_v2 }
 0xf11   :  { %v925_v50 = vpop.permute.xlu1 %924 }
 0xf12   :  { %v927_v51 = vmul.f32 %v2834_v2, %v925_v50 }
 0xf14   :  { %929 = vrot.lane.b32.xlu0 %v927_v51, %s2942_s18 }
 0xf18   :  { %948 = vrot.lane.b32.xlu0 %v947_v54, %s2944_s1 }
 0xf1c   :  { %973 = vperm.xlu0 %2773, %v970_v56  }
 0xf86   :  { %v930_v57 = vpop.permute.xlu0 %929 }
 0xf87   :  { %v932_v58 = vadd.f32 %v930_v57, %v224_v45 }
 0xf89   :  { %2835 = vtanh.f32 %v932_v58 }
 0xf8a   :  { %v949_v60 = vpop.permute.xlu0 %948 }
 0xf8b   :  { %v951_v63 = vmul.f32 %v2834_v2, %v949_v60 }
 0xf93   :  { %v2836_v59 = vpop.eup %2835 }
 0xf94   :  { %936 = vrot.lane.b32.xlu1 %v2836_v59, %s2946_s21 }
 0xf98   :  { %955 = vperm.xlu1 %2772, %v2390_v52  }
 0xf9b   :  { %v974_v11 = vpop.permute.xlu0 %973 }
 0xf9c   :  { %v976_v13 = vmul.f32 %v974_v11, %v863_v29  ;;  %v2777_v11 = vld [vmem:[%s3697_s8] sm:$0xff]  }
 0xf9d   :  { %2619 = vmatprep.subr.bf16.mxu1 %v2777_v11 }
0x1006   :  { %v937_v62 = vpop.permute.xlu1 %936 }
0x1007   :  { %v939_v6 = vmul.f32 %v937_v62, %v934_v61 }
0x1009   :  { %v952_v8 = vadd.f32 %v951_v63, %v939_v6 }
0x100b   :  { %v965_v9 = vrot.slane %v952_v8, %v3130_v38 }
0x100d   :  { %966 = vrot.lane.b32.xlu1 %v965_v9, %s2946_s21 }
0x1017   :  { %v956_v10 = vpop.permute.xlu1 %955 }
0x107f   :  { %v967_v12 = vpop.permute.xlu1 %966 }
0x1080   :  { %v969_v14 = vmul.f32 %v967_v12, %v956_v10  ;;  %v2778_v12 = vld [vmem:[%s3697_s8 + $0x8] sm:$0xff]  }
0x1082   :  { %v977_v15 = vadd.f32 %v976_v13, %v969_v14  ;;  %v1332_v18 = vrot.slane %v969_v14, %v3109_v24  ;;  %v3329_v13 = vld [vmem:[%s3692_s3] sm:$0xff]  }
0x1084   :  { %v978_v16 = vpack.c.bf16 %v977_v15, %v977_v15  ;;  %v1333_v17 = vcombine.high %v1332_v18, %v1332_v18  ;;  %v1340_v19 = vrot.slane %v1332_v18, %v3109_v24  ;;  %v1061_v53 = vrot.slane %v977_v15, %v3130_v38 }
0x1086   :  { %v1347_v20 = vrot.slane %v1333_v17, %v3109_v24  ;;  %v1437_v21 = vrot.slane %v1340_v19, %v3180_v5  ;;  %2608 = vmatmul.mubr.msk.bf16.vlgmr.msra.gmra.mrb[12].mxu1 %vm286_vm1, %v978_v16 }
0x1087   :  { %2623 = vmatprep.mubr.msk.bf16.mxu1 %vm286_vm1, %v3329_v13  ;;  %2620 = vmatpush3.bf16.msra.mxu1 %v2777_v11 }
0x1088   :  { %v1441_v22 = vrot.slane %v1347_v20, %v3180_v5  ;;  %v1477_v23 = vsel %vm1476_vm13, %v1474_v55, %v1437_v21  ;;  %2621 = vmatprep.subr.bf16.mxu1 %v2778_v12  ;;  %v3338_v20 = vld [vmem:[%s3692_s3 + $0x8] sm:$0xff]   ;;  %v3344_v21 = vld [vmem:[%s3692_s3 + $0x10] sm:$0xff]  }
0x108a   :  { %v1478_v25 = vsel %vm1476_vm13, %v1475_v39, %v1441_v22  ;;  %v3359_v22 = vld [vmem:[%s3692_s3 + $0x20] sm:$0xff]  }
0x108b   :  { %2622 = vmatpush3.bf16.msra.mxu1 %v2778_v12 }
0x108c   :  { %2675 = vmatprep.subr.bf16.mxu1 %v2939_v1 }
0x108e   :  { %2624 = vmatmul.mubr.msk.bf16.vlgmr.msra.gmra.mrb[16].mxu1 %vm286_vm1, %v3338_v20 }
0x108f   :  { %2627 = vmatprep.mubr.msk.bf16.mxu1 %vm286_vm1, %v3344_v21 }
0x1159   :  { %v1016_v26 = vpop.f32.mrb[12].mxu1 }
0x115a   :  { %v1029_v27 = vadd.f32 %v1016_v26, %v3127_v37  ;;  %v2609_v28 = vpop.f32.mrb[13].mxu1  ;;  %v1022_v33 = vadd.f32 %v1016_v26, %v3292_v32  ;;  %v3382_v26 = vld [vmem:[%s3692_s3 + $0x38] sm:$0xff]  }
0x115b   :  { %v1019_v3 = vpop.f32.mrb[14].mxu1  ;;  %v3396_v28 = vld [vmem:[%s3692_s3 + $0x48] sm:$0xff]  }
0x115c   :  { %v1037_v29 = vrot.slane %v1029_v27, %v3130_v38  ;;  %v2610_v30 = vpop.f32.mrb[15].mxu1  ;;  %v2409_v34 = vmul.f32 -1.442695, %v1022_v33  ;;  %v3387_v27 = vld [vmem:[%s3692_s3 + $0x40] sm:$0xff]   ;;  %v3401_v3 = vld [vmem:[%s3692_s3 + $0x50] sm:$0xff]   ;;  %v225_v33 = vcombine.high %v3292_v32, %v3292_v32 }
0x115d   :  { %v3415_v30 = vld [vmem:[%s3692_s3 + $0x60] sm:$0xff]  }
0x115e   :  { %1038 = vrot.lane.b32.xlu0 %v1037_v29, %s2942_s18  ;;  %2837 = vpow2.f32 %v2409_v34  ;;  %v3410_v29 = vld [vmem:[%s3692_s3 + $0x58] sm:$0xff]  }
0x1168   :  { %v2838_v35 = vpop.eup %2837 }
0x1169   :  { %v1026_v36 = vadd.f32 1.0, %v2838_v35 }
0x116b   :  { %2839 = vrcp.f32 %v1026_v36 }
0x1175   :  { %v2840_v55 = vpop.eup %2839 }
0x1176   :  { %v1048_v46 = vsub.f32 1.0, %v2840_v55 }
0x11d0   :  { %v1039_v39 = vpop.permute.xlu0 %1038 }
0x11d1   :  { %v1041_v40 = vmul.f32 %v2840_v55, %v1039_v39 }
0x11d3   :  { %1043 = vrot.lane.b32.xlu1 %v1041_v40, %s2942_s18 }
0x11d7   :  { %1062 = vrot.lane.b32.xlu1 %v1061_v53, %s2944_s1  ;;  %v3437_v53 = vld [vmem:[%s3692_s3 + $0x70] sm:$0xff]  }
0x11db   :  { %1087 = vperm.xlu1 %2772, %v1084_v42  }
0x1245   :  { %v1044_v43 = vpop.permute.xlu1 %1043 }
0x1246   :  { %v1046_v0 = vadd.f32 %v1044_v43, %v3292_v32  ;;  %v3442_v32 = vld [vmem:[%s3692_s3 + $0x78] sm:$0xff]   ;;  %v3456_v43 = vld [vmem:[%s3698_s9] ss:$0 sm:$0xff] }
0x1248   :  { %2841 = vtanh.f32 %v1046_v0  ;;  %v2625_v0 = vpop.f32.mrb[16].mxu1 }
0x1249   :  { %v1063_v45 = vpop.permute.xlu1 %1062 }
0x124a   :  { %v1065_v48 = vmul.f32 %v2840_v55, %v1063_v45  ;;  %v1702_v45 = vpop.f32.mrb[17].mxu1 }
0x1252   :  { %v2842_v44 = vpop.eup %2841 }
0x1253   :  { %1050 = vrot.lane.b32.xlu0 %v2842_v44, %s2946_s21  ;;  %v1711_v44 = vadd.f32 %v2625_v0, %v3456_v43 }
0x1257   :  { %1069 = vperm.xlu0 %2773, %v2391_v41  }
0x125a   :  { %v1088_v52 = vpop.permute.xlu1 %1087 }
0x125b   :  { %v1090_v56 = vmul.f32 %v1088_v52, %v977_v15 }
0x12c5   :  { %v1051_v47 = vpop.permute.xlu0 %1050 }
0x12c6   :  { %v1053_v49 = vmul.f32 %v1051_v47, %v1048_v46  ;;  %v1703_v46 = vadd.f32 %v3456_v43, %v1702_v45  ;;  %v2626_v47 = vpop.f32.mrb[18].mxu1 }
0x12c8   :  { %v1066_v2 = vadd.f32 %v1065_v48, %v1053_v49  ;;  %v1714_v48 = vadd.f32 %v2626_v47, %v3456_v43  ;;  %v1705_v49 = vpop.f32.mrb[19].mxu1 }
0x12ca   :  { %v1079_v50 = vrot.slane %v1066_v2, %v3130_v38  ;;  %v1706_v2 = vadd.f32 %v3456_v43, %v1705_v49 }
0x12cc   :  { %1080 = vrot.lane.b32.xlu0 %v1079_v50, %s2946_s21  ;;  %v1832_v50 = vpack.c.bf16 %v1714_v48, %v1711_v44 }
0x12d6   :  { %v1070_v51 = vpop.permute.xlu0 %1069 }
0x133e   :  { %v1081_v54 = vpop.permute.xlu0 %1080 }
0x133f   :  { %v1083_v57 = vmul.f32 %v1081_v54, %v1070_v51  ;;  %v1831_v51 = vpack.c.bf16 %v1706_v2, %v1703_v46 }
0x1341   :  { %v3304_v58 = vadd.f32 %v1090_v56, %v1083_v57  ;;  %v1355_v59 = vrot.slane %v1083_v57, %v3109_v24  ;;  %v1851_v56 = vsel %vm286_vm1, %v1831_v51, 0 }
0x1343   :  { %v1092_v60 = vpack.c.bf16 %v3304_v58, %v3304_v58  ;;  %v1356_v61 = vcombine.high %v1355_v59, %v1355_v59  ;;  %v1363_v62 = vrot.slane %v1355_v59, %v3109_v24  ;;  %v1175_v42 = vrot.slane %v3304_v58, %v3130_v38 }
0x1345   :  { %v1370_v63 = vrot.slane %v1356_v61, %v3109_v24  ;;  %v1447_v6 = vrot.slane %v1363_v62, %v3180_v5  ;;  %2616 = vmatmul.mubr.msk.bf16.vlgmr.msra.gmra.mrb[16].mxu0 %vm286_vm1, %v1092_v60  ;;  %v1854_v62 = vsel %vm286_vm1, %v1832_v50, 0 }
0x1346   :  { %2671 = vmatprep.mubr.msk.bf16.mxu0 %vm2940_vm0, %v2939_v1  ;;  %2656 = vmatpush3.bf16.xpose.msra.mxu0 %v1851_v56 }
0x1347   :  { %v1451_v8 = vrot.slane %v1370_v63, %v3180_v5  ;;  %v3316_v9 = vsel %vm1479_vm15, %v1477_v23, %v1447_v6  ;;  %v3368_v23 = vld [vmem:[%s3692_s3 + $0x28] sm:$0xff]   ;;  %2657 = vmatprep.subr.bf16.mxu0 %v2939_v1 }
0x1349   :  { %v3318_v10 = vsel %vm1479_vm15, %v1478_v25, %v1451_v8  ;;  %v3373_v25 = vld [vmem:[%s3692_s3 + $0x30] sm:$0xff]  }
0x134e   :  { %2658 = vmatpush3.bf16.xpose.msra.mxu0 %v1854_v62 }
0x134f   :  { %2659 = vmatprep.subr.bf16.mxu0 %v2939_v1 }
0x1418   :  { %v1130_v14 = vpop.f32.mrb[16].mxu0 }
0x1419   :  { %v1143_v15 = vadd.f32 %v1130_v14, %v3127_v37  ;;  %v2617_v18 = vpop.f32.mrb[17].mxu0  ;;  %v3354_v37 = vld [vmem:[%s3692_s3 + $0x18] sm:$0xff]   ;;  %v1136_v34 = vadd.f32 %v1130_v14, %v225_v33 }
0x141a   :  { %v1133_v16 = vpop.f32.mrb[18].mxu0  ;;  %2628 = vmatmul.mubr.msk.bf16.gmra.mrb[20].mxu1 %vm286_vm1, %v3354_v37  ;;  %v3473_v18 = vsel %vm2384_vm2, 1.0, %v2939_v1 }
0x141b   :  { %v1151_v17 = vrot.slane %v1143_v15, %v3130_v38  ;;  %v2618_v19 = vpop.f32.mrb[19].mxu0  ;;  %2631 = vmatprep.mubr.msk.bf16.mxu1 %vm286_vm1, %v3359_v22  ;;  %v2411_v35 = vmul.f32 -1.442695, %v1136_v34 }
0x141d   :  { %1152 = vrot.lane.b32.xlu1 %v1151_v17, %s2942_s18  ;;  %2843 = vpow2.f32 %v2411_v35 }
0x1422   :  { %2632 = vmatmul.mubr.msk.bf16.gmra.mrb[24].mxu1 %vm286_vm1, %v3368_v23 }
0x1423   :  { %2635 = vmatprep.mubr.msk.bf16.mxu1 %vm286_vm1, %v3373_v25 }
0x1427   :  { %v2844_v36 = vpop.eup %2843 }
0x1428   :  { %v1140_v55 = vadd.f32 1.0, %v2844_v36 }
0x142a   :  { %2636 = vmatmul.mubr.msk.bf16.gmra.mrb[28].mxu1 %vm286_vm1, %v3382_v26  ;;  %2845 = vrcp.f32 %v1140_v55 }
0x142b   :  { %2639 = vmatprep.mubr.msk.bf16.mxu1 %vm286_vm1, %v3387_v27 }
0x1432   :  { %2640 = vmatmul.mubr.msk.bf16.gmra.mrb[32].mxu1 %vm286_vm1, %v3396_v28 }
0x1433   :  { %2643 = vmatprep.mubr.msk.bf16.mxu1 %vm286_vm1, %v3401_v3 }
0x1434   :  { %v3430_v39 = vpop.eup %2845 }
0x143a   :  { %2644 = vmatmul.mubr.msk.bf16.gmra.mrb[36].mxu1 %vm286_vm1, %v3410_v29 }
0x143b   :  { %2647 = vmatprep.mubr.msk.bf16.mxu1 %vm286_vm1, %v3415_v30 }
0x1442   :  { %2648 = vmatmul.mubr.msk.bf16.gmra.mrb[40].mxu1 %vm286_vm1, %v3424_v31 }
0x1443   :  { %2651 = vmatprep.mubr.msk.bf16.mxu1 %vm286_vm1, %v3437_v53 }
0x144a   :  { %2652 = vmatmul.mubr.msk.bf16.gmra.mrb[44].mxu1 %vm286_vm1, %v3442_v32 }
0x144b   :  { %2691 = vmatprep.mubr.msk.bf16.mxu1 %vm2940_vm0, %v2939_v1 }
0x148f   :  { %v1153_v40 = vpop.permute.xlu1 %1152 }
0x1490   :  { %v1155_v41 = vmul.f32 %v3430_v39, %v1153_v40 }
0x1492   :  { %1157 = vrot.lane.b32.xlu0 %v1155_v41, %s2942_s18 }
0x1496   :  { %1176 = vrot.lane.b32.xlu0 %v1175_v42, %s2944_s1 }
0x14ed   :  { %v2629_v57 = vpop.f32.mrb[20].mxu1 }
0x14ee   :  { %v1727_v59 = vadd.f32 %v2629_v57, %v3456_v43  ;;  %v1718_v60 = vpop.f32.mrb[21].mxu1 }
0x14ef   :  { %v1719_v61 = vadd.f32 %v3456_v43, %v1718_v60  ;;  %v2630_v63 = vpop.f32.mrb[22].mxu1 }
0x14f0   :  { %v1730_v6 = vadd.f32 %v2630_v63, %v3456_v43  ;;  %v1721_v8 = vpop.f32.mrb[23].mxu1 }
0x14f1   :  { %v1722_v11 = vadd.f32 %v3456_v43, %v1721_v8 }
0x14f2   :  { %v1834_v12 = vpack.c.bf16 %v1730_v6, %v1727_v59 }
0x14f3   :  { %v1833_v15 = vpack.c.bf16 %v1722_v11, %v1719_v61 }
0x14f4   :  { %v1860_v49 = vsel %vm286_vm1, %v1834_v12, 0 }
0x14f5   :  { %v1857_v16 = vsel %vm286_vm1, %v1833_v15, 0  ;;  %v2633_v17 = vpop.f32.mrb[24].mxu1 }
0x14f6   :  { %v1743_v19 = vadd.f32 %v2633_v17, %v3456_v43  ;;  %2660 = vmatpush3.bf16.xpose.msra.mxu0 %v1857_v16 }
0x14f7   :  { %2661 = vmatprep.subr.bf16.mxu0 %v2939_v1 }
0x14fe   :  { %2662 = vmatpush3.bf16.xpose.msra.mxu0 %v1860_v49 }
0x14ff   :  { %2663 = vmatprep.subr.bf16.mxu0 %v2939_v1 }
0x1504   :  { %v1158_v52 = vpop.permute.xlu0 %1157 }
0x1505   :  { %v1160_v54 = vadd.f32 %v1158_v52, %v225_v33  ;;  %v1734_v33 = vpop.f32.mrb[25].mxu1 }
0x1506   :  { %v1735_v4 = vadd.f32 %v3456_v43, %v1734_v33  ;;  %v2634_v34 = vpop.f32.mrb[26].mxu1 }
0x1507   :  { %2847 = vtanh.f32 %v1160_v54  ;;  %v1746_v35 = vadd.f32 %v2634_v34, %v3456_v43  ;;  %v1737_v36 = vpop.f32.mrb[27].mxu1 }
0x1508   :  { %v1738_v55 = vadd.f32 %v3456_v43, %v1737_v36  ;;  %v2637_v40 = vpop.f32.mrb[28].mxu1 }
0x1509   :  { %v1836_v41 = vpack.c.bf16 %v1746_v35, %v1743_v19  ;;  %v3483_v42 = vadd.f32 %v2637_v40, %v3456_v43  ;;  %v1750_v0 = vpop.f32.mrb[29].mxu1 }
0x150a   :  { %v1835_v44 = vpack.c.bf16 %v1738_v55, %v1735_v4  ;;  %v1751_v45 = vadd.f32 %v3456_v43, %v1750_v0  ;;  %v2638_v46 = vpop.f32.mrb[30].mxu1 }
0x150b   :  { %v1762_v47 = vadd.f32 %v2638_v46, %v3456_v43  ;;  %v1753_v48 = vpop.f32.mrb[31].mxu1 }
0x150c   :  { %v1754_v2 = vadd.f32 %v3456_v43, %v1753_v48  ;;  %v2641_v50 = vpop.f32.mrb[32].mxu1  ;;  %v1863_v19 = vsel %vm286_vm1, %v1835_v44, 0 }
0x150d   :  { %v1838_v51 = vpack.c.bf16 %v1762_v47, %v3483_v42  ;;  %v1775_v52 = vadd.f32 %v2641_v50, %v3456_v43  ;;  %v1766_v54 = vpop.f32.mrb[33].mxu1  ;;  %2664 = vmatpush3.bf16.xpose.msra.mxu0 %v1863_v19 }
0x150e   :  { %v1837_v56 = vpack.c.bf16 %v1754_v2, %v1751_v45  ;;  %v1767_v57 = vadd.f32 %v3456_v43, %v1766_v54  ;;  %v2642_v59 = vpop.f32.mrb[34].mxu1  ;;  %2665 = vmatprep.subr.bf16.mxu0 %v2939_v1  ;;  %v1866_v2 = vsel %vm286_vm1, %v1836_v41, 0 }
0x150f   :  { %v1778_v60 = vadd.f32 %v2642_v59, %v3456_v43  ;;  %v1769_v61 = vpop.f32.mrb[35].mxu1  ;;  %v1872_v41 = vsel %vm286_vm1, %v1838_v51, 0 }
0x1510   :  { %v1770_v62 = vadd.f32 %v3456_v43, %v1769_v61  ;;  %v2645_v63 = vpop.f32.mrb[36].mxu1 }
0x1511   :  { %v2848_v14 = vpop.eup %2847  ;;  %v1840_v6 = vpack.c.bf16 %v1778_v60, %v1775_v52  ;;  %v1791_v8 = vadd.f32 %v2645_v63, %v3456_v43  ;;  %v1782_v11 = vpop.f32.mrb[37].mxu1  ;;  %v1869_v52 = vsel %vm286_vm1, %v1837_v56, 0 }
0x1512   :  { %1164 = vrot.lane.b32.xlu1 %v2848_v14, %s2946_s21  ;;  %v1839_v12 = vpack.c.bf16 %v1770_v62, %v1767_v57  ;;  %v1783_v14 = vadd.f32 %v3456_v43, %v1782_v11  ;;  %v2646_v15 = vpop.f32.mrb[38].mxu1 }
0x1513   :  { %v1794_v16 = vadd.f32 %v2646_v15, %v3456_v43  ;;  %v1785_v17 = vpop.f32.mrb[39].mxu1  ;;  %v1921_v48 = vsel %vm286_vm1, %v1840_v6, 0 }
0x1514   :  { %v1918_v33 = vsel %vm286_vm1, %v1839_v12, 0  ;;  %v1786_v4 = vadd.f32 %v3456_v43, %v1785_v17  ;;  %v1162_v17 = vsub.f32 1.0, %v3430_v39 }
0x1515   :  { %v2649_v34 = vpop.f32.mrb[40].mxu1  ;;  %2676 = vmatpush3.bf16.xpose.msra.mxu1 %v1918_v33  ;;  %v1842_v35 = vpack.c.bf16 %v1794_v16, %v1791_v8  ;;  %2666 = vmatpush3.bf16.xpose.msra.mxu0 %v1866_v2  ;;  %v1177_v16 = vpop.permute.xlu0 %1176 }
0x1516   :  { %1183 = vperm.xlu1 %2772, %v3473_v18   ;;  %v1807_v36 = vadd.f32 %v2649_v34, %v3456_v43  ;;  %v1798_v55 = vpop.f32.mrb[41].mxu1  ;;  %2677 = vmatprep.subr.bf16.mxu1 %v2939_v1  ;;  %v1841_v40 = vpack.c.bf16 %v1786_v4, %v1783_v14  ;;  %v1179_v33 = vmul.f32 %v3430_v39, %v1177_v16 }
0x1517   :  { %v1799_v42 = vadd.f32 %v3456_v43, %v1798_v55  ;;  %v2650_v0 = vpop.f32.mrb[42].mxu1  ;;  %2667 = vmatprep.subr.bf16.mxu0 %v2939_v1  ;;  %v1927_v54 = vsel %vm286_vm1, %v1842_v35, 0 }
0x1518   :  { %v1810_v45 = vadd.f32 %v2650_v0, %v3456_v43  ;;  %v1801_v44 = vpop.f32.mrb[43].mxu1  ;;  %v1924_v50 = vsel %vm286_vm1, %v1841_v40, 0 }
0x1519   :  { %v1802_v46 = vadd.f32 %v3456_v43, %v1801_v44 }
0x151a   :  { %v1844_v47 = vpack.c.bf16 %v1810_v45, %v1807_v36 }
0x151b   :  { %v1843_v49 = vpack.c.bf16 %v1802_v46, %v1799_v42 }
0x151c   :  { %v1933_v56 = vsel %vm286_vm1, %v1844_v47, 0 }
0x151d   :  { %2678 = vmatpush3.bf16.xpose.msra.mxu1 %v1921_v48  ;;  %2668 = vmatpush3.bf16.xpose.msra.mxu0 %v1869_v52  ;;  %v1930_v57 = vsel %vm286_vm1, %v1843_v49, 0  ;;  %v2653_v59 = vpop.f32.mrb[44].mxu1 }
0x151e   :  { %2679 = vmatprep.subr.bf16.mxu1 %v2939_v1  ;;  %2669 = vmatprep.subr.bf16.mxu0 %v2939_v1  ;;  %v1823_v60 = vadd.f32 %v2653_v59, %v3456_v43  ;;  %v1814_v51 = vpop.f32.mrb[45].mxu1 }
0x151f   :  { %v1815_v61 = vadd.f32 %v3456_v43, %v1814_v51  ;;  %v2654_v62 = vpop.f32.mrb[46].mxu1  ;;  %v2798_v51 = vld [vmem:[%s3699_s10 + $0x8] sm:$0xff]  }
0x1520   :  { %v1826_v63 = vadd.f32 %v2654_v62, %v3456_v43  ;;  %v1817_v6 = vpop.f32.mrb[47].mxu1 }
0x1521   :  { %v1818_v8 = vadd.f32 %v3456_v43, %v1817_v6 }
0x1522   :  { %v1846_v11 = vpack.c.bf16 %v1826_v63, %v1823_v60  ;;  %v2796_v60 = vld [vmem:[%s3700_s11 + $0x8] sm:$0xff]  }
0x1523   :  { %v1845_v12 = vpack.c.bf16 %v1818_v8, %v1815_v61 }
0x1524   :  { %v1939_v15 = vsel %vm286_vm1, %v1846_v11, 0 }
0x1525   :  { %2680 = vmatpush3.bf16.xpose.msra.mxu1 %v1924_v50  ;;  %2670 = vmatpush3.bf16.xpose.msra.mxu0 %v1872_v41  ;;  %v1936_v14 = vsel %vm286_vm1, %v1845_v12, 0 }
0x1526   :  { %2681 = vmatprep.subr.bf16.mxu1 %v2939_v1  ;;  %2695 = vmatprep.subr.bf16.mxu0 %v2939_v1 }
0x152d   :  { %2682 = vmatpush3.bf16.xpose.msra.mxu1 %v1927_v54  ;;  %v2795_v54 = vld [vmem:[%s3700_s11] sm:$0xff]  }
0x152e   :  { %2683 = vmatprep.subr.bf16.mxu1 %v2939_v1 }
0x1535   :  { %2684 = vmatpush3.bf16.xpose.msra.mxu1 %v1930_v57 }
0x1536   :  { %2685 = vmatprep.subr.bf16.mxu1 %v2939_v1 }
0x153d   :  { %2686 = vmatpush3.bf16.xpose.msra.mxu1 %v1933_v56  ;;  %v2797_v56 = vld [vmem:[%s3699_s10] sm:$0xff]  }
0x153e   :  { %2687 = vmatprep.subr.bf16.mxu1 %v2939_v1 }
0x1545   :  { %2688 = vmatpush3.bf16.xpose.msra.mxu1 %v1936_v14 }
0x1546   :  { %2689 = vmatprep.subr.bf16.mxu1 %v2939_v1 }
0x154d   :  { %2690 = vmatpush3.bf16.xpose.msra.mxu1 %v1939_v15 }
0x154e   :  { %2715 = vmatprep.subr.bf16.mxu1 %v2939_v1 }
0x1584   :  { %v1165_v19 = vpop.permute.xlu1 %1164 }
0x1585   :  { %v1167_v4 = vmul.f32 %v1165_v19, %v1162_v17 }
0x1587   :  { %v1180_v43 = vadd.f32 %v1179_v33, %v1167_v4  ;;  %v2799_v4 = vld [vmem:[%s3702_s13] sm:$0xff]  }
0x1589   :  { %v1193_v34 = vrot.slane %v1180_v43, %v3130_v38  ;;  %v2800_v43 = vld [vmem:[%s3702_s13 + $0x8] sm:$0xff]  }
0x158b   :  { %1194 = vrot.lane.b32.xlu0 %v1193_v34, %s2946_s21 }
0x1595   :  { %v1184_v35 = vpop.permute.xlu1 %1183 }
0x15fd   :  { %v1195_v36 = vpop.permute.xlu0 %1194 }
0x15fe   :  { %v3535_v55 = vmul.f32 %v1195_v36, %v1184_v35  ;;  %v2455_v35 = vld [vmem:[%s3701_s12] ss:$0 sm:$0xff]  ;;  %s2947_s12 = smov [#allocation4]  }
0x1600   :  { %v1378_v40 = vrot.slane %v3535_v55, %v3109_v24 }
0x1602   :  { %v1379_v42 = vcombine.high %v1378_v40, %v1378_v40  ;;  %v1386_v0 = vrot.slane %v1378_v40, %v3109_v24 }
0x1604   :  { %v1393_v45 = vrot.slane %v1379_v42, %v3109_v24  ;;  %v1457_v39 = vrot.slane %v1386_v0, %v3180_v5 }
0x1606   :  { %v1461_v44 = vrot.slane %v1393_v45, %v3180_v5  ;;  %v3544_v38 = vsel %vm1482_vm3, %v3316_v9, %v1457_v39  ;;  %v1982_v5 = vand.u32 127, %v87_v7 }
0x1607   :  { %v1829_v46 = vpack.c.bf16 %v3544_v38, %v3544_v38 }
0x1608   :  { %v3549_v47 = vsel %vm1482_vm3, %v3318_v10, %v1461_v44  ;;  %vm1983_vm4 = vcmp.lt.s32.totalorder %v1982_v5, 10 }
0x1609   :  { %v1830_v48 = vpack.c.bf16 %v3549_v47, %v3549_v47  ;;  %2672 = vmatmul.mubr.msk.bf16.vlgmr.msra.gmra.mrb[20].mxu0 %vm286_vm1, %v1829_v46  ;;  %v2109_v24 = vpack.c.bf16 %v3549_v47, %v3544_v38 }
0x160a   :  { %2696 = vmatpush3.bf16.msra.mxu0 %v3329_v13  ;;  %2711 = vmatprep.mubr.msk.bf16.mxu0 %vm2940_vm0, %v2939_v1 }
0x160b   :  { %2692 = vmatmul.mubr.msk.bf16.vlgmr.msra.gmra.mrb[48].mxu1 %vm286_vm1, %v1830_v48  ;;  %2697 = vmatprep.subr.bf16.mxu0 %v2939_v1 }
0x160c   :  { %2716 = vmatpush3.bf16.msra.mxu1 %v3387_v27  ;;  %2731 = vmatprep.mubr.msk.bf16.mxu1 %vm2940_vm0, %v2939_v1 }
0x160d   :  { %2717 = vmatprep.subr.bf16.mxu1 %v2939_v1 }
0x160e   :  { %2698 = vmatpush3.bf16.msra.mxu0 %v3338_v20 }
0x160f   :  { %2699 = vmatprep.subr.bf16.mxu0 %v2939_v1 }
0x1610   :  { %2718 = vmatpush3.bf16.msra.mxu1 %v3396_v28 }
0x1611   :  { %2719 = vmatprep.subr.bf16.mxu1 %v2939_v1 }
0x1612   :  { %2700 = vmatpush3.bf16.msra.mxu0 %v3344_v21 }
0x1613   :  { %2701 = vmatprep.subr.bf16.mxu0 %v2939_v1 }
0x1614   :  { %2720 = vmatpush3.bf16.msra.mxu1 %v3401_v3 }
0x1615   :  { %2721 = vmatprep.subr.bf16.mxu1 %v2939_v1 }
0x1616   :  { %2702 = vmatpush3.bf16.msra.mxu0 %v3354_v37 }
0x1617   :  { %2703 = vmatprep.subr.bf16.mxu0 %v2939_v1 }
0x1618   :  { %2722 = vmatpush3.bf16.msra.mxu1 %v3410_v29 }
0x1619   :  { %2723 = vmatprep.subr.bf16.mxu1 %v2939_v1 }
0x161a   :  { %2704 = vmatpush3.bf16.msra.mxu0 %v3359_v22 }
0x161b   :  { %2705 = vmatprep.subr.bf16.mxu0 %v2939_v1 }
0x161c   :  { %2724 = vmatpush3.bf16.msra.mxu1 %v3415_v30 }
0x161d   :  { %2725 = vmatprep.subr.bf16.mxu1 %v2939_v1 }
0x161e   :  { %2706 = vmatpush3.bf16.msra.mxu0 %v3368_v23 }
0x161f   :  { %2707 = vmatprep.subr.bf16.mxu0 %v2939_v1 }
0x1620   :  { %2726 = vmatpush3.bf16.msra.mxu1 %v3424_v31 }
0x1621   :  { %2727 = vmatprep.subr.bf16.mxu1 %v2939_v1 }
0x1622   :  { %2708 = vmatpush3.bf16.msra.mxu0 %v3373_v25 }
0x1623   :  { %2709 = vmatprep.subr.bf16.mxu0 %v2939_v1 }
0x1624   :  { %2728 = vmatpush3.bf16.msra.mxu1 %v3437_v53 }
0x1625   :  { %2729 = vmatprep.subr.bf16.mxu1 %v2939_v1 }
0x1626   :  { %2710 = vmatpush3.bf16.msra.mxu0 %v3382_v26 }
0x1627   :  { %2735 = vmatprep.subr.bf16.mxu0 %v2939_v1 }
0x1628   :  { %2730 = vmatpush3.bf16.msra.mxu1 %v3442_v32 }
0x1629   :  { %2743 = vmatprep.subr.bf16.mxu1 %v2939_v1 }
0x16dc   :  { %v1908_v9 = vpop.f32.mrb[20].mxu0 }
0x16dd   :  { %v2673_v10 = vpop.f32.mrb[21].mxu0  ;;  %v1984_v13 = vsel %vm1983_vm4, %v1908_v9, -1e+30 }
0x16de   :  { %v1975_v20 = vpop.f32.mrb[48].mxu1  ;;  %1986 = vmax.xlane.f32.xlu1 %v1984_v13  ;;  %v1911_v21 = vpop.f32.mrb[22].mxu0 }
0x16df   :  { %v2674_v37 = vpop.f32.mrb[23].mxu0  ;;  %v2693_v22 = vpop.f32.mrb[49].mxu1  ;;  %v1985_v23 = vsel %vm1983_vm4, %v1975_v20, -1e+30 }
0x16e0   :  { %1988 = vmax.xlane.f32.xlu0 %v1985_v23  ;;  %v1978_v25 = vpop.f32.mrb[50].mxu1 }
0x16e1   :  { %v2694_v26 = vpop.f32.mrb[51].mxu1 }
0x176b   :  { %v1987_v27 = vpop.xlane.xlu1 %1986 }
0x176c   :  { %v1990_v28 = vsub.f32 %v1984_v13, %v1987_v27 }
0x176d   :  { %v1989_v3 = vpop.xlane.xlu0 %1988 }
0x176e   :  { %v1992_v29 = vmul.f32 1.442695, %v1990_v28  ;;  %v1991_v30 = vsub.f32 %v1985_v23, %v1989_v3  ;;  %v1198_v28 = vsub.f32 1.0, %v3473_v18 }
0x1770   :  { %2849 = vpow2.f32 %v1992_v29  ;;  %v1994_v7 = vmul.f32 1.442695, %v1991_v30 }
0x1772   :  { %2851 = vpow2.f32 %v1994_v7 }
0x177a   :  { %v2850_v31 = vpop.eup %2849 }
0x177b   :  { %1996 = vadd.xlane.f32.xlu0 %v2850_v31 }
0x177c   :  { %v2852_v53 = vpop.eup %2851 }
0x177d   :  { %1998 = vadd.xlane.f32.xlu1 %v2852_v53 }
0x1808   :  { %v1997_v32 = vpop.xlane.xlu0 %1996 }
0x1809   :  { %2853 = vrcp.f32 %v1997_v32 }
0x180a   :  { %v1999_v49 = vpop.xlane.xlu1 %1998 }
0x180b   :  { %2855 = vrcp.f32 %v1999_v49 }
0x1813   :  { %v2854_v2 = vpop.eup %2853 }
0x1814   :  { %v2001_v50 = vmul.f32 %v2854_v2, %v2850_v31 }
0x1815   :  { %v2856_v52 = vpop.eup %2855 }
0x1816   :  { %v2006_v41 = vpack.c.bf16 %v2001_v50, %v2001_v50  ;;  %2004 = vst [vmem:[#allocation4] sm:$0xff] %v2001_v50  ;;  %v2003_v57 = vmul.f32 %v2856_v52, %v2852_v53 }
0x1818   :  { %2712 = vmatmul.mubr.bf16.vlgmr.msra.gmra.mrb[24].mxu0 %v2006_v41  ;;  %v2007_v59 = vpack.c.bf16 %v2003_v57, %v2003_v57  ;;  %2005 = vst [vmem:[#allocation4 + $0x8] sm:$0xff] %v2003_v57 }
0x1819   :  { %2736 = vmatpush3.bf16.msra.mxu0 %v2795_v54  ;;  %2739 = vmatprep.mubr.msk.bf16.mxu0 %vm2940_vm0, %v2939_v1 }
0x181a   :  { %2732 = vmatmul.mubr.bf16.vlgmr.msra.gmra.mrb[52].mxu1 %v2007_v59  ;;  %2737 = vmatprep.subr.bf16.mxu0 %v2939_v1 }
0x181b   :  { %2744 = vmatpush3.bf16.msra.mxu1 %v2797_v56  ;;  %2747 = vmatprep.mubr.msk.bf16.mxu1 %vm2940_vm0, %v2939_v1 }
0x181c   :  { %2745 = vmatprep.subr.bf16.mxu1 %v2939_v1 }
0x181d   :  { %2738 = vmatpush3.bf16.msra.mxu0 %v2796_v60 }
0x181e   :  { %2751 = vmatprep.subr.bf16.mxu0 %v2939_v1 }
0x181f   :  { %2746 = vmatpush3.bf16.msra.mxu1 %v2798_v51 }
0x1820   :  { %2740 = vmatmul.mubr.msk.bf16.vlgmr.msra.gmra.mrb[28].mxu0 %vm286_vm1, %v2109_v24 }
0x1821   :  { %2755 = vmatprep.mubr.msk.bf16.mxu0 %vm2940_vm0, %v2939_v1  ;;  %2752 = vmatpush3.bf16.msra.mxu0 %v2799_v4 }
0x1822   :  { %2753 = vmatprep.subr.bf16.mxu0 %v2939_v1  ;;  %v2456_v1 = vld [vmem:[%s3703_s14] ss:$0 sm:$0xff]  ;;  %s2346_s14 = sshll.u32 %s2947_s12, 4  ;;  %s2347_s14 = int_to_ptr.vmem [resolvable:$true] %s2346_s14 }
0x1823   :  { %s2869_s0 = scalar_lea.vmem %s2347_s14, 256  ;;  %p2874_p1 = scmp.lt.s32.totalorder %s2347_s14, %s2347_s14 }
0x1824   :  { %p2870_p0 = scmp.ne.s32.totalorder %s2347_s14, %s2869_s0  ;;  %p2875_p2 = scmp.lt.s32.totalorder %s2869_s0, %s2869_s0 }
0x1825   :  { %2754 = vmatpush3.bf16.msra.mxu0 %v2800_v43 }
0x1826   :  { %p2876_p3 = por %p2875_p2, %p2874_p1 }
0x1828   :  { %p2877_p4 = pnand %p2876_p3, %p2870_p0 }
0x18eb   :  { %v2050_v61 = vpop.f32.mrb[24].mxu0 }
0x18ec   :  { %v2713_v62 = vpop.f32.mrb[25].mxu0 }
0x18ed   :  { %v2053_v63 = vpop.f32.mrb[26].mxu0  ;;  %v2098_v6 = vpop.f32.mrb[52].mxu1 }
0x18ee   :  { %v2104_v8 = vpack.c.bf16 %v2098_v6, %v2050_v61  ;;  %v2714_v11 = vpop.f32.mrb[27].mxu0  ;;  %v2733_v12 = vpop.f32.mrb[53].mxu1 }
0x18ef   :  { %v2101_v14 = vpop.f32.mrb[54].mxu1 }
0x18f0   :  { %v2734_v15 = vpop.f32.mrb[55].mxu1  ;;  %2748 = vmatmul.mubr.msk.bf16.vlgmr.msra.gmra.mrb[56].mxu1 %vm286_vm1, %v2104_v8 }
0x18f3   :  { %v2163_v16 = vpop.f32.mrb[28].mxu0 }
0x18f4   :  { %v2741_v17 = vpop.f32.mrb[29].mxu0 }
0x18f5   :  { %v2166_v19 = vpop.f32.mrb[30].mxu0 }
0x18f6   :  { %v2742_v33 = vpop.f32.mrb[31].mxu0 }
0x19c3   :  { %v2219_v34 = vpop.f32.mrb[56].mxu1 }
0x19c4   :  { %v2220_v36 = vadd.f32 %v2219_v34, %v2163_v16  ;;  %v2749_v40 = vpop.f32.mrb[57].mxu1 }
0x19c5   :  { %v2222_v42 = vpop.f32.mrb[58].mxu1 }
0x19c6   :  { %v2233_v0 = vadd.f32 %v2455_v35, %v2220_v36  ;;  %v2223_v45 = vadd.f32 %v2222_v42, %v2166_v19  ;;  %v2750_v39 = vpop.f32.mrb[59].mxu1 }
0x19c8   :  { %v2234_v44 = vadd.f32 %v2455_v35, %v2223_v45  ;;  %2857 = vtanh.f32 %v2233_v0 }
0x19ca   :  { %2859 = vtanh.f32 %v2234_v44 }
0x19d2   :  { %v2858_v38 = vpop.eup %2857 }
0x19d4   :  { %v2860_v46 = vpop.eup %2859 }
0x19d5   :  { %v2237_v47 = vpack.c.bf16 %v2860_v46, %v2858_v38 }
0x19d7   :  { %2756 = vmatmul.mubr.msk.bf16.vlgmr.msra.gmra.mrb[32].mxu0 %vm286_vm1, %v2237_v47 }
0x1aaa   :  { %v2298_v48 = vpop.f32.mrb[32].mxu0 }
0x1aab   :  { %v3634_v24 = vadd.f32 %v2456_v1, %v2298_v48  ;;  %v2757_v5 = vpop.f32.mrb[33].mxu0 }
0x1aac   :  { %v2301_v9 = vpop.f32.mrb[34].mxu0 }
0x1aad   :  { %v3636_v10 = vadd.f32 %v2456_v1, %v2301_v9  ;;  %2305 = vmax.xlane.f32.xlu0 %v3634_v24  ;;  %v2758_v13 = vpop.f32.mrb[35].mxu0 }
0x1aaf   :  { %2307 = vmax.xlane.f32.xlu1 %v3636_v10 }
0x1b3a   :  { %v2306_v20 = vpop.xlane.xlu0 %2305 }
0x1b3b   :  { %v2309_v21 = vsub.f32 %v3634_v24, %v2306_v20 }
0x1b3c   :  { %v2308_v37 = vpop.xlane.xlu1 %2307 }
0x1b3d   :  { %v2311_v22 = vmul.f32 1.442695, %v2309_v21  ;;  %v2310_v23 = vsub.f32 %v3636_v10, %v2308_v37 }
0x1b3f   :  { %2861 = vpow2.f32 %v2311_v22  ;;  %v2313_v25 = vmul.f32 1.442695, %v2310_v23 }
0x1b41   :  { %2863 = vpow2.f32 %v2313_v25 }
0x1b49   :  { %v2862_v26 = vpop.eup %2861 }
0x1b4a   :  { %2315 = vadd.xlane.f32.xlu0 %v2862_v26 }
0x1b4b   :  { %v2864_v27 = vpop.eup %2863 }
0x1b4c   :  { %2317 = vadd.xlane.f32.xlu1 %v2864_v27 }
0x1b60   :  { %1201 = vperm.xlu0 %2773, %v1198_v28  }
0x1b61   :  { %2880 = shalt.err (!%p2877_p4)
}
0x1b62   :  { %s2881_s7 = scalar_lea.hbm %s3705_s16, 256 }
0x1b63   :  { %p2882_p5 = scmp.ne.s32.totalorder %s3705_s16, %s2881_s7  ;;  %p2885_p6 = scmp.lt.u32.totalorder %s2881_s7, %s3705_s16 }
0x1b65   :  { %p2887_p7 = pnand %p2885_p6, %p2882_p5 }
0x1b67   :  { %2890 = shalt.err (!%p2887_p7)
}
0x1b68   :  { %s2948_s18 = smov 128   ;;  %s2949_s4 = smov 8   ;;  %vm1206_vm0 = vcmask 254976  }
0x1b69   :  { %2352 = dma.vmem_to_hbm [thread:$0]  %s2347_s14, 256, %s3705_s16, [#allocation5], %s2948_s18, %s2948_s18, %s2949_s4  }
0x1b6a   :  { %s2950_s1 = smov [#allocation6]  }
0x1b6b   :  { %s2359_s21 = sshll.u32 %s2950_s1, 4  ;;  %s2360_s21 = int_to_ptr.vmem [resolvable:$true] %s2359_s21 }
0x1b6c   :  { %s2891_s16 = scalar_lea.vmem %s2360_s21, 32  ;;  %p2896_p9 = scmp.lt.s32.totalorder %s2360_s21, %s2360_s21 }
0x1b6d   :  { %p2892_p8 = scmp.ne.s32.totalorder %s2360_s21, %s2891_s16  ;;  %p2897_p10 = scmp.lt.s32.totalorder %s2891_s16, %s2891_s16 }
0x1b6f   :  { %p2898_p11 = por %p2897_p10, %p2896_p9 }
0x1b71   :  { %p2899_p12 = pnand %p2898_p11, %p2892_p8 }
0x1bd7   :  { %v2316_v18 = vpop.xlane.xlu0 %2315 }
0x1bd8   :  { %2865 = vlog2.f32 %v2316_v18 }
0x1bd9   :  { %v2318_v3 = vpop.xlane.xlu1 %2317 }
0x1bda   :  { %2867 = vlog2.f32 %v2318_v3 }
0x1bdf   :  { %v1202_v29 = vpop.permute.xlu0 %1201 }
0x1be0   :  { %v1204_v30 = vmul.f32 %v1202_v29, %v3304_v58 }
0x1be2   :  { %v2866_v7 = vpop.eup %2865  ;;  %v1205_v31 = vadd.f32 %v1204_v30, %v3535_v55 }
0x1be3   :  { %v2320_v53 = vmul.f32 0.6931472, %v2866_v7 }
0x1be4   :  { %v2868_v32 = vpop.eup %2867  ;;  %1207 = vst.msk [vmem:[#allocation6] sm:$0x3] %vm1206_vm0, %v1205_v31 }
0x1be5   :  { %v2323_v49 = vadd.f32 %v2320_v53, %v2306_v20  ;;  %v2322_v2 = vmul.f32 0.6931472, %v2868_v32 }
0x1be6   :  { %2902 = shalt.err (!%p2899_p12)
}
0x1be7   :  { %s2903_s11 = scalar_lea.hbm %s3706_s17, 32 }
0x1be8   :  { %p2904_p13 = scmp.ne.s32.totalorder %s3706_s17, %s2903_s11  ;;  %p2907_p0 = scmp.lt.u32.totalorder %s2903_s11, %s3706_s17 }
0x1bea   :  { %p2909_p1 = pnand %p2907_p0, %p2904_p13 }
0x1bec   :  { %2912 = shalt.err (!%p2909_p1)
}
0x1bed   :  { %2362 = dma.vmem_to_hbm [thread:$0]  %s2360_s21, 32, %s3706_s17, [#allocation5]   ;;  %v2324_v58 = vadd.f32 %v2322_v2, %v2308_v37  ;;  %v2325_v55 = vsub.f32 %v3634_v24, %v2323_v49 }
0x1bee   :  { %s2951_s28 = smov [#allocation2]  }
0x1bef   :  { %s2334_s13 = sshll.u32 %s2951_s28, 4  ;;  %v2326_v50 = vsub.f32 %v3636_v10, %v2324_v58  ;;  %2327 = vst [vmem:[#allocation2] sm:$0xff] %v2325_v55  ;;  %s2335_s13 = int_to_ptr.vmem [resolvable:$true] %s2334_s13 }
0x1bf0   :  { %s2913_s29 = scalar_lea.vmem %s2335_s13, 256  ;;  %p2918_p3 = scmp.lt.s32.totalorder %s2335_s13, %s2335_s13 }
0x1bf1   :  { %2328 = vst [vmem:[#allocation2 + $0x8] sm:$0xff] %v2326_v50  ;;  %p2914_p2 = scmp.ne.s32.totalorder %s2335_s13, %s2913_s29  ;;  %p2919_p4 = scmp.lt.s32.totalorder %s2913_s29, %s2913_s29 }
0x1bf3   :  { %p2920_p5 = por %p2919_p4, %p2918_p3 }
0x1bf5   :  { %p2921_p6 = pnand %p2920_p5, %p2914_p2 }
0x1bf7   :  { %2924 = shalt.err (!%p2921_p6)
}
0x1bf8   :  { %s2925_s17 = scalar_lea.hbm %s3704_s15, 256 }
0x1bf9   :  { %p2926_p7 = scmp.ne.s32.totalorder %s3704_s15, %s2925_s17  ;;  %p2929_p8 = scmp.lt.u32.totalorder %s2925_s17, %s3704_s15 }
0x1bfb   :  { %p2931_p9 = pnand %p2929_p8, %p2926_p7 }
0x1bfd   :  { %2934 = shalt.err (!%p2931_p9)
}
0x1bfe   :  { %2340 = dma.vmem_to_hbm [thread:$0]  %s2335_s13, 256, %s3704_s15, [#allocation3], %s2948_s18, %s2948_s18, %s2949_s4  }
0x1bff   :  { %2935 = dma.done.wait [#allocation3], 256  }
0x1c00   :  { %2936 = vsyncadd [#allocation3], 4294967040 }
0x1c01   :  { %2937 = dma.done.wait [#allocation5], 288  }
0x1c02   :  { %2938 = vsyncadd [#allocation5], 4294967008 }
0x1c03   :  { %2372 = vsyncpa [#allocation3], 1 }
0x1c04   :  { %2373 = vsyncpa [#allocation5], 1 }

</bundles_post_ra>
